<compile_context>
chip_gen: v5e
topology: v5e:2x2
jax: 0.10.0
libtpu: 0.0.40
codegen_flags: <defaults>
</compile_context>

<pallas_src>
import jax
import jax.numpy as jnp
from jax.experimental import pallas as pl
from jax.experimental.pallas import tpu as pltpu

IN_FEATURES = 875
K_PAD = 896        # 875 padded up to 7*128 (lane-aligned K for the first matmul)
OUT_PAD = 128      # final layer 2 -> 128 lane-dense output columns


def _round_up(n, m):
    return ((n + m - 1) // m) * m


def mlp_kernel(x_ref,
               w1_ref, b1_ref,
               w2_ref, b2_ref,
               w3_ref, b3_ref,
               w4_ref, b4_ref,
               o_ref):
    # FC1: Linear(896->512) with BN folded in, + ReLU.  x arrives bf16 already.
    h = jnp.dot(x_ref[...], w1_ref[...],
                preferred_element_type=jnp.float32) + b1_ref[...]
    h = jnp.maximum(h, 0.0)

    # FC2: Linear(512->256) with BN folded in, + ReLU
    h = jnp.dot(h.astype(jnp.bfloat16), w2_ref[...],
                preferred_element_type=jnp.float32) + b2_ref[...]
    h = jnp.maximum(h, 0.0)

    # FC3: Linear(256->128) with BN folded in, + Sigmoid (EUP exp/recip path)
    h = jnp.dot(h.astype(jnp.bfloat16), w3_ref[...],
                preferred_element_type=jnp.float32) + b3_ref[...]
    h = jax.nn.sigmoid(h)

    # FC4: Linear(128->2), padded to 128 output columns for a lane-dense bf16 store
    out = jnp.dot(h.astype(jnp.bfloat16), w4_ref[...],
                  preferred_element_type=jnp.float32) + b4_ref[...]
    o_ref[...] = out.astype(o_ref.dtype)


def mlp_forward(x, params, *, block_b=1024):
    (w1, b1, w2, b2, w3, b3, w4, b4) = params
    B, F = x.shape

    # Batch tile: large enough to amortize per-grid-step overhead, multiple of 8
    # for the (8,128) sublane constraint.
    b8 = _round_up(B, 8)
    tb = min(block_b, b8)
    # v7x has 2 TensorCores; the "parallel" batch axis is the only thing that
    # shards across them, so guarantee >= 2 grid steps when the batch allows it.
    if b8 > 8 and tb >= b8:
        tb = _round_up(pl.cdiv(b8, 2), 8)
    Bp = _round_up(B, tb)

    # Zero-pad input to [Bp, 896] and cast to bf16 in one shot; padded rows/cols
    # are inert (sliced off below).
    xp = jnp.zeros((Bp, K_PAD), jnp.bfloat16).at[:B, :F].set(
        x.astype(jnp.bfloat16))

    act_spec = pl.BlockSpec((tb, K_PAD), lambda i: (i, 0))
    out_spec = pl.BlockSpec((tb, OUT_PAD), lambda i: (i, 0))

    def pinned(a):
        # Full-array block, constant index -> fetched once, resident across grid.
        return pl.BlockSpec(a.shape, lambda i: (0, 0))

    flops = 2 * Bp * (K_PAD * 512 + 512 * 256 + 256 * 128 + 128 * OUT_PAD)
    bytes_accessed = (int(xp.size) * 2
                      + sum(int(p.size) * p.dtype.itemsize for p in params)
                      + Bp * OUT_PAD * 2)
    cost = pl.CostEstimate(flops=flops,
                           transcendentals=Bp * 128,
                           bytes_accessed=bytes_accessed)

    out = pl.pallas_call(
        mlp_kernel,
        out_shape=jax.ShapeDtypeStruct((Bp, OUT_PAD), jnp.bfloat16),
        grid=(Bp // tb,),
        in_specs=[act_spec] + [pinned(p) for p in params],
        out_specs=out_spec,
        compiler_params=pltpu.CompilerParams(
            dimension_semantics=("parallel",),
            vmem_limit_bytes=32 * 1024 * 1024),
        cost_estimate=cost,
    )(xp, *params)

    return out[:B, :2].astype(jnp.float32)


def _linear_init(key, fan_in, fan_out):
    # Mirrors PyTorch nn.Linear default init: U(-1/sqrt(fan_in), 1/sqrt(fan_in)).
    kw, kb = jax.random.split(key)
    bound = 1.0 / (fan_in ** 0.5)
    w = jax.random.uniform(kw, (fan_in, fan_out), jnp.float32, -bound, bound)
    b = jax.random.uniform(kb, (1, fan_out), jnp.float32, -bound, bound)
    return w, b


def _bn_fold(fan_out, eps=1e-5):
    # PyTorch BatchNorm1d default state: gamma=1, beta=0, running_mean=0, running_var=1.
    gamma = jnp.ones((1, fan_out), jnp.float32)
    beta = jnp.zeros((1, fan_out), jnp.float32)
    running_mean = jnp.zeros((1, fan_out), jnp.float32)
    running_var = jnp.ones((1, fan_out), jnp.float32)
    scale = gamma / jnp.sqrt(running_var + eps)
    shift = beta - running_mean * scale
    return scale, shift


def make_params(key):
    k1, k2, k3, k4 = jax.random.split(key, 4)
    w1, b1 = _linear_init(k1, IN_FEATURES, 512)
    s1, t1 = _bn_fold(512)
    w2, b2 = _linear_init(k2, 512, 256)
    s2, t2 = _bn_fold(256)
    w3, b3 = _linear_init(k3, 256, 128)
    s3, t3 = _bn_fold(128)
    w4, b4 = _linear_init(k4, 128, 2)

    # Fold inference-mode BatchNorm affine into the preceding Linear:
    #   (x@w + b) * s + t  ==  x@(w*s) + (b*s + t)
    def fold(w, b, s, t):
        return w * s, b * s + t

    w1, b1 = fold(w1, b1, s1, t1)
    w2, b2 = fold(w2, b2, s2, t2)
    w3, b3 = fold(w3, b3, s3, t3)

    # Zero-pad w1's K dim 875 -> 896 (matches the lane-padded input).
    w1 = jnp.zeros((K_PAD, 512), jnp.float32).at[:IN_FEATURES, :].set(w1)
    # Zero-pad final layer output 2 -> 128 for a lane-dense store.
    w4 = jnp.zeros((128, OUT_PAD), jnp.float32).at[:, :2].set(w4)
    b4 = jnp.zeros((1, OUT_PAD), jnp.float32).at[:, :2].set(b4)

    # Weights in bf16 (halves dominant HBM traffic); biases stay f32.
    bf = lambda w: w.astype(jnp.bfloat16)
    return (bf(w1), b1, bf(w2), b2, bf(w3), b3, bf(w4), b4)


def reference_forward(x, params):
    # Pure-JAX reference using the same bf16-rounded weights / bf16 activations
    # with f32 accumulation, so it mirrors the kernel's precision.
    (w1, b1, w2, b2, w3, b3, w4, b4) = params

    def dot_bf16(a, w):
        return jnp.dot(a.astype(jnp.bfloat16), w,
                       preferred_element_type=jnp.float32)

    xp = jnp.zeros((x.shape[0], K_PAD), jnp.float32).at[:, :x.shape[1]].set(x)
    h = jnp.maximum(dot_bf16(xp, w1) + b1, 0.0)
    h = jnp.maximum(dot_bf16(h, w2) + b2, 0.0)
    h = jax.nn.sigmoid(dot_bf16(h, w3) + b3)
    return (dot_bf16(h, w4) + b4)[:, :2]


if __name__ == "__main__":
    key = jax.random.PRNGKey(0)
    kx, kp = jax.random.split(key)
    params = make_params(kp)

    # Small single-tile path (grid = 1).
    B = 8
    x = jax.random.normal(kx, (B, IN_FEATURES), jnp.float32)
    out = jax.block_until_ready(mlp_forward(x, params))
    ref = reference_forward(x, params)
    assert out.shape == (B, 2), out.shape
    err = float(jnp.max(jnp.abs(out - ref)))
    assert jnp.allclose(out, ref, atol=2e-2, rtol=2e-2), err

    # Small multi-tile path (grid >= 2, exercises batch padding + parallel axis).
    B2 = 24
    x2 = jax.random.normal(kx, (B2, IN_FEATURES), jnp.float32)
    out2 = jax.block_until_ready(mlp_forward(x2, params))
    ref2 = reference_forward(x2, params)
    assert out2.shape == (B2, 2), out2.shape
    err2 = float(jnp.max(jnp.abs(out2 - ref2)))
    assert jnp.allclose(out2, ref2, atol=2e-2, rtol=2e-2), err2

    print("KERNEL_OK")
</pallas_src>

<mosaic_0001>
module attributes {stable_mosaic.version = 11 : i64} {
  func.func @mlp_kernel(%arg0: i32, %arg1: memref<8x896xbf16, #tpu.memory_space<vmem>>, %arg2: memref<896x512xbf16, #tpu.memory_space<vmem>>, %arg3: memref<1x512xf32, #tpu.memory_space<vmem>>, %arg4: memref<512x256xbf16, #tpu.memory_space<vmem>>, %arg5: memref<1x256xf32, #tpu.memory_space<vmem>>, %arg6: memref<256x128xbf16, #tpu.memory_space<vmem>>, %arg7: memref<1x128xf32, #tpu.memory_space<vmem>>, %arg8: memref<128x128xbf16, #tpu.memory_space<vmem>>, %arg9: memref<1x128xf32, #tpu.memory_space<vmem>>, %arg10: memref<8x128xbf16, #tpu.memory_space<vmem>>) attributes {dimension_semantics = [#tpu.dimension_semantics<parallel>], iteration_bounds = array<i64: 1>, scalar_prefetch = 0 : i64, scratch_operands = 0 : i64, tpu.core_type = #tpu.core_type<tc>, window_params = [{transform_indices = @transform_0, window_bounds = array<i64: 8, 896>}, {pipeline_mode = #tpu.pipeline_mode<synchronous>, transform_indices = @transform_1, window_bounds = array<i64: 896, 512>}, {pipeline_mode = #tpu.pipeline_mode<synchronous>, transform_indices = @transform_2, window_bounds = array<i64: 1, 512>}, {pipeline_mode = #tpu.pipeline_mode<synchronous>, transform_indices = @transform_3, window_bounds = array<i64: 512, 256>}, {pipeline_mode = #tpu.pipeline_mode<synchronous>, transform_indices = @transform_4, window_bounds = array<i64: 1, 256>}, {pipeline_mode = #tpu.pipeline_mode<synchronous>, transform_indices = @transform_5, window_bounds = array<i64: 256, 128>}, {pipeline_mode = #tpu.pipeline_mode<synchronous>, transform_indices = @transform_6, window_bounds = array<i64: 1, 128>}, {pipeline_mode = #tpu.pipeline_mode<synchronous>, transform_indices = @transform_7, window_bounds = array<i64: 128, 128>}, {pipeline_mode = #tpu.pipeline_mode<synchronous>, transform_indices = @transform_8, window_bounds = array<i64: 1, 128>}, {transform_indices = @transform_9, window_bounds = array<i64: 8, 128>}]} {
    %c0 = arith.constant 0 : index
    %c0_0 = arith.constant 0 : index
    %0 = vector.load %arg1[%c0, %c0_0] : memref<8x896xbf16, #tpu.memory_space<vmem>>, vector<8x896xbf16>
    %c0_1 = arith.constant 0 : index
    %c0_2 = arith.constant 0 : index
    %1 = vector.load %arg2[%c0_1, %c0_2] : memref<896x512xbf16, #tpu.memory_space<vmem>>, vector<896x512xbf16>
    %cst = arith.constant dense<0.000000e+00> : vector<8x512xf32>
    %2 = tpu.matmul %0, %1, %cst {dimension_numbers = #tpu.dot_dimension_numbers<[1], [0], [0], [1], [0, 0, 1, 1], [], []>} : vector<8x896xbf16>, vector<896x512xbf16>, vector<8x512xf32> -> vector<8x512xf32>
    %c0_3 = arith.constant 0 : index
    %c0_4 = arith.constant 0 : index
    %3 = vector.load %arg3[%c0_3, %c0_4] : memref<1x512xf32, #tpu.memory_space<vmem>>, vector<1x512xf32>
    %4 = vector.broadcast %3 : vector<1x512xf32> to vector<8x512xf32>
    %5 = arith.addf %2, %4 : vector<8x512xf32>
    %cst_5 = arith.constant 0.000000e+00 : f32
    %6 = vector.broadcast %cst_5 : f32 to vector<8x512xf32>
    %7 = arith.maximumf %5, %6 : vector<8x512xf32>
    %8 = arith.truncf %7 : vector<8x512xf32> to vector<8x512xbf16>
    %c0_6 = arith.constant 0 : index
    %c0_7 = arith.constant 0 : index
    %9 = vector.load %arg4[%c0_6, %c0_7] : memref<512x256xbf16, #tpu.memory_space<vmem>>, vector<512x256xbf16>
    %cst_8 = arith.constant dense<0.000000e+00> : vector<8x256xf32>
    %10 = tpu.matmul %8, %9, %cst_8 {dimension_numbers = #tpu.dot_dimension_numbers<[1], [0], [0], [1], [0, 0, 1, 1], [], []>} : vector<8x512xbf16>, vector<512x256xbf16>, vector<8x256xf32> -> vector<8x256xf32>
    %c0_9 = arith.constant 0 : index
    %c0_10 = arith.constant 0 : index
    %11 = vector.load %arg5[%c0_9, %c0_10] : memref<1x256xf32, #tpu.memory_space<vmem>>, vector<1x256xf32>
    %12 = vector.broadcast %11 : vector<1x256xf32> to vector<8x256xf32>
    %13 = arith.addf %10, %12 : vector<8x256xf32>
    %cst_11 = arith.constant 0.000000e+00 : f32
    %14 = vector.broadcast %cst_11 : f32 to vector<8x256xf32>
    %15 = arith.maximumf %13, %14 : vector<8x256xf32>
    %16 = arith.truncf %15 : vector<8x256xf32> to vector<8x256xbf16>
    %c0_12 = arith.constant 0 : index
    %c0_13 = arith.constant 0 : index
    %17 = vector.load %arg6[%c0_12, %c0_13] : memref<256x128xbf16, #tpu.memory_space<vmem>>, vector<256x128xbf16>
    %cst_14 = arith.constant dense<0.000000e+00> : vector<8x128xf32>
    %18 = tpu.matmul %16, %17, %cst_14 {dimension_numbers = #tpu.dot_dimension_numbers<[1], [0], [0], [1], [0, 0, 1, 1], [], []>} : vector<8x256xbf16>, vector<256x128xbf16>, vector<8x128xf32> -> vector<8x128xf32>
    %c0_15 = arith.constant 0 : index
    %c0_16 = arith.constant 0 : index
    %19 = vector.load %arg7[%c0_15, %c0_16] : memref<1x128xf32, #tpu.memory_space<vmem>>, vector<1x128xf32>
    %20 = vector.broadcast %19 : vector<1x128xf32> to vector<8x128xf32>
    %21 = arith.addf %18, %20 : vector<8x128xf32>
    %22 = arith.negf %21 : vector<8x128xf32>
    %23 = math.exp %22 : vector<8x128xf32>
    %cst_17 = arith.constant 1.000000e+00 : f32
    %24 = vector.broadcast %cst_17 : f32 to vector<8x128xf32>
    %25 = arith.addf %24, %23 : vector<8x128xf32>
    %26 = arith.divf %24, %25 : vector<8x128xf32>
    %27 = arith.truncf %26 : vector<8x128xf32> to vector<8x128xbf16>
    %c0_18 = arith.constant 0 : index
    %c0_19 = arith.constant 0 : index
    %28 = vector.load %arg8[%c0_18, %c0_19] : memref<128x128xbf16, #tpu.memory_space<vmem>>, vector<128x128xbf16>
    %cst_20 = arith.constant dense<0.000000e+00> : vector<8x128xf32>
    %29 = tpu.matmul %27, %28, %cst_20 {dimension_numbers = #tpu.dot_dimension_numbers<[1], [0], [0], [1], [0, 0, 1, 1], [], []>} : vector<8x128xbf16>, vector<128x128xbf16>, vector<8x128xf32> -> vector<8x128xf32>
    %c0_21 = arith.constant 0 : index
    %c0_22 = arith.constant 0 : index
    %30 = vector.load %arg9[%c0_21, %c0_22] : memref<1x128xf32, #tpu.memory_space<vmem>>, vector<1x128xf32>
    %31 = vector.broadcast %30 : vector<1x128xf32> to vector<8x128xf32>
    %32 = arith.addf %29, %31 : vector<8x128xf32>
    %33 = arith.truncf %32 : vector<8x128xf32> to vector<8x128xbf16>
    %c0_23 = arith.constant 0 : index
    %c0_24 = arith.constant 0 : index
    %34 = vector.load %arg10[%c0_23, %c0_24] : memref<8x128xbf16, #tpu.memory_space<vmem>>, vector<8x128xbf16>
    tpu.vector_store %arg10[%c0_23, %c0_24], %33 {strides = array<i32>} : memref<8x128xbf16, #tpu.memory_space<vmem>>, vector<8x128xbf16>,
    return
  }
  func.func @transform_0(%arg0: i32) -> (i32, i32) {
    %c0_i32 = arith.constant 0 : i32
    %c0_i32_0 = arith.constant 0 : i32
    return %arg0, %c0_i32 : i32, i32
  }
  func.func @transform_1(%arg0: i32) -> (i32, i32) {
    %c0_i32 = arith.constant 0 : i32
    %c0_i32_0 = arith.constant 0 : i32
    %c0_i32_1 = arith.constant 0 : i32
    return %c0_i32, %c0_i32_0 : i32, i32
  }
  func.func @transform_2(%arg0: i32) -> (i32, i32) {
    %c0_i32 = arith.constant 0 : i32
    %c0_i32_0 = arith.constant 0 : i32
    %c0_i32_1 = arith.constant 0 : i32
    return %c0_i32, %c0_i32_0 : i32, i32
  }
  func.func @transform_3(%arg0: i32) -> (i32, i32) {
    %c0_i32 = arith.constant 0 : i32
    %c0_i32_0 = arith.constant 0 : i32
    %c0_i32_1 = arith.constant 0 : i32
    return %c0_i32, %c0_i32_0 : i32, i32
  }
  func.func @transform_4(%arg0: i32) -> (i32, i32) {
    %c0_i32 = arith.constant 0 : i32
    %c0_i32_0 = arith.constant 0 : i32
    %c0_i32_1 = arith.constant 0 : i32
    return %c0_i32, %c0_i32_0 : i32, i32
  }
  func.func @transform_5(%arg0: i32) -> (i32, i32) {
    %c0_i32 = arith.constant 0 : i32
    %c0_i32_0 = arith.constant 0 : i32
    %c0_i32_1 = arith.constant 0 : i32
    return %c0_i32, %c0_i32_0 : i32, i32
  }
  func.func @transform_6(%arg0: i32) -> (i32, i32) {
    %c0_i32 = arith.constant 0 : i32
    %c0_i32_0 = arith.constant 0 : i32
    %c0_i32_1 = arith.constant 0 : i32
    return %c0_i32, %c0_i32_0 : i32, i32
  }
  func.func @transform_7(%arg0: i32) -> (i32, i32) {
    %c0_i32 = arith.constant 0 : i32
    %c0_i32_0 = arith.constant 0 : i32
    %c0_i32_1 = arith.constant 0 : i32
    return %c0_i32, %c0_i32_0 : i32, i32
  }
  func.func @transform_8(%arg0: i32) -> (i32, i32) {
    %c0_i32 = arith.constant 0 : i32
    %c0_i32_0 = arith.constant 0 : i32
    %c0_i32_1 = arith.constant 0 : i32
    return %c0_i32, %c0_i32_0 : i32, i32
  }
  func.func @transform_9(%arg0: i32) -> (i32, i32) {
    %c0_i32 = arith.constant 0 : i32
    %c0_i32_0 = arith.constant 0 : i32
    return %arg0, %c0_i32 : i32, i32
  }
}

</mosaic_0001>

<bundles_post_ra>
// kernel: tpu_custom_call.1
= control target key start
LH: loop header
LB: loop body
LE: loop exit
PB: predicated region body
PF: predicated region fallthrough
CT: control target
= control target key end

     0   :  { %14 = vsyncpa [#allocation3], 0  ;;  %s4596_s0 = inlined_call_operand.hbm [shape: bf16[8,896], index: 0, kind: input, shape index: {}]   ;;  %s4597_s1 = inlined_call_operand.hbm [shape: bf16[896,512], index: 1, kind: input, shape index: {}]   ;;  %s4598_s2 = inlined_call_operand.hbm [shape: f32[1,512], index: 2, kind: input, shape index: {}]   ;;  %s4599_s3 = inlined_call_operand.hbm [shape: bf16[512,256], index: 3, kind: input, shape index: {}]   ;;  %s4600_s4 = inlined_call_operand.vmem [shape: f32[1,256], index: 4, kind: input, shape index: {}]   ;;  %s4601_s5 = inlined_call_operand.hbm [shape: bf16[256,128], index: 5, kind: input, shape index: {}]   ;;  %s4602_s6 = inlined_call_operand.vmem [shape: f32[1,128], index: 6, kind: input, shape index: {}]   ;;  %s4603_s7 = inlined_call_operand.hbm [shape: bf16[128,128], index: 7, kind: input, shape index: {}]   ;;  %s4604_s8 = inlined_call_operand.vmem [shape: f32[1,128], index: 8, kind: input, shape index: {}]   ;;  %s4605_s9 = inlined_call_operand.hbm [shape: bf16[8,128], index: 9, kind: output, shape index: {}]  }
   0x1   :  { %15 = vsyncpa [#allocation6], 0 }
   0x2   :  { %16 = vsyncpa [#allocation9], 0 }
   0x3   :  { %17 = vsyncpa [#allocation12], 0  ;;  %s34_s11 = sshll.u32 %s4597_s1, 4  ;;  %s35_s11 = int_to_ptr.hbm [resolvable:$true] %s34_s11 }
   0x4   :  { %18 = vsyncpa [#allocation4], 0  ;;  %s4415_s12 = smov [#allocation5]   ;;  %s58_s16 = sshll.u32 %s4599_s3, 4  ;;  %s59_s16 = int_to_ptr.hbm [resolvable:$true] %s58_s16 }
   0x5   :  { %s36_s13 = sshll.u32 %s4415_s12, 4  ;;  %s4416_s17 = smov 256   ;;  %s37_s13 = int_to_ptr.vmem [resolvable:$true] %s36_s13 }
   0x6   :  { %s4417_s18 = smov 16   ;;  %s4418_s19 = smov [#allocation8]  }
   0x7   :  { %42 = dma.hbm_to_vmem [thread:$0]  %s35_s11, 28672, %s37_s13, [#allocation6], %s4416_s17, %s4416_s17, %s4417_s18  }
   0x8   :  { %s60_s20 = sshll.u32 %s4418_s19, 4  ;;  %s4419_s21 = smov 128   ;;  %s61_s20 = int_to_ptr.vmem [resolvable:$true] %s60_s20 }
   0x9   :  { %s4420_s22 = smov 8   ;;  %s24_s24 = sshll.u32 %s4596_s0, 4  ;;  %s25_s24 = int_to_ptr.hbm [resolvable:$true] %s24_s24 }
   0xa   :  { %66 = dma.hbm_to_vmem [thread:$0]  %s59_s16, 8192, %s61_s20, [#allocation9], %s4419_s21, %s4419_s21, %s4420_s22  }
   0xb   :  { %s4421_s25 = smov [#allocation2]   ;;  %s48_s28 = sshll.u32 %s4598_s2, 4  ;;  %s49_s28 = int_to_ptr.hbm [resolvable:$true] %s48_s28 }
   0xc   :  { %s26_s26 = sshll.u32 %s4421_s25, 4  ;;  %s4422_s29 = smov [#allocation7]   ;;  %s27_s26 = int_to_ptr.vmem [resolvable:$true] %s26_s26 }
   0xd   :  { %29 = dma.hbm_to_vmem [thread:$0]  %s25_s24, 448, %s27_s26, [#allocation3]  }
   0xe   :  { %s50_s30 = sshll.u32 %s4422_s29, 4  ;;  %s73_s12 = sshll.u32 %s4601_s5, 4  ;;  %s51_s30 = int_to_ptr.vmem [resolvable:$true] %s50_s30  ;;  %s74_s12 = int_to_ptr.hbm [resolvable:$true] %s73_s12 }
   0xf   :  { %53 = dma.hbm_to_vmem [thread:$0]  %s49_s28, 64, %s51_s30, [#allocation6]  }
  0x10   :  { %s4423_s0 = smov [#allocation10]   ;;  %s88_s16 = sshll.u32 %s4603_s7, 4  ;;  %s89_s16 = int_to_ptr.hbm [resolvable:$true] %s88_s16 }
  0x11   :  { %s75_s13 = sshll.u32 %s4423_s0, 4  ;;  %s4424_s17 = smov 64   ;;  %s76_s13 = int_to_ptr.vmem [resolvable:$true] %s75_s13 }
  0x12   :  { %s4425_s2 = smov 4   ;;  %s4426_s18 = smov [#allocation11]  }
  0x13   :  { %81 = dma.hbm_to_vmem [thread:$0]  %s74_s12, 2048, %s76_s13, [#allocation9], %s4424_s17, %s4424_s17, %s4425_s2  }
  0x14   :  { %s90_s19 = sshll.u32 %s4426_s18, 4  ;;  %s91_s19 = int_to_ptr.vmem [resolvable:$true] %s90_s19 }
  0x15   :  { %96 = dma.hbm_to_vmem [thread:$0]  %s89_s16, 1024, %s91_s19, [#allocation12], %s4424_s17, %s4424_s17, %s4425_s2  }
  0x16   :  { %4405 = dma.done.wait [#allocation3], 448  }
  0x17   :  { %4406 = vsyncadd [#allocation3], 4294966848 }
  0x18   :  { %4407 = dma.done.wait [#allocation6], 28736  }
  0x19   :  { %4408 = vsyncadd [#allocation6], 4294938560 }
  0x1a   :  { %4409 = dma.done.wait [#allocation9], 10240  }
  0x1b   :  { %4410 = vsyncadd [#allocation9], 4294957056 }
  0x1c   :  { %4411 = dma.done.wait [#allocation12], 1024  }
  0x1d   :  { %4412 = vsyncadd [#allocation12], 4294966272  ;;  %v2771_v0 = vld [vmem:[#allocation5 + $0xe0] sm:$0xf]  ;;  %v3936_v1 = vld [vmem:[#allocation5 + $0xec] sm:$0xf0] }
  0x1e   :  { %v2899_v2 = vld [vmem:[#allocation5 + $0x1e0] sm:$0xf]  ;;  %v2772_v3 = vor.u32 %v3936_v1, %v2771_v0  ;;  %v3968_v4 = vld [vmem:[#allocation5 + $0x1ec] sm:$0xf0]  ;;  %s4427_s22 = smov [#allocation13]   ;;  %s2644_s25 = sshll.u32 %s4605_s9, 4  ;;  %s2645_s25 = int_to_ptr.hbm [resolvable:$true] %s2644_s25 }
  0x1f   :  { %v3027_v5 = vld [vmem:[#allocation5 + $0x2e0] sm:$0xf]  ;;  %v4000_v6 = vld [vmem:[#allocation5 + $0x2ec] sm:$0xf0]  ;;  %v2900_v7 = vor.u32 %v3968_v4, %v2899_v2  ;;  %s2642_s1 = sshll.u32 %s4427_s22, 4  ;;  %s2643_s1 = int_to_ptr.vmem [resolvable:$true] %s2642_s1 }
  0x20   :  { %v3028_v8 = vor.u32 %v4000_v6, %v3027_v5  ;;  %v3155_v9 = vld [vmem:[#allocation5 + $0x3e0] sm:$0xf]  ;;  %v4032_v10 = vld [vmem:[#allocation5 + $0x3ec] sm:$0xf0]  ;;  %1506 = vmatpush.bf16.msra.mxu0 %v2772_v3 }
  0x21   :  { %v2755_v11 = vld [vmem:[#allocation5 + $0xc0] sm:$0xf]  ;;  %v3156_v12 = vor.u32 %v4032_v10, %v3155_v9  ;;  %v3932_v13 = vld [vmem:[#allocation5 + $0xcc] sm:$0xf0]  ;;  %1519 = vmatpush.bf16.msra.mxu1 %v2900_v7 }
  0x22   :  { %v2883_v14 = vld [vmem:[#allocation5 + $0x1c0] sm:$0xf]  ;;  %v3964_v15 = vld [vmem:[#allocation5 + $0x1cc] sm:$0xf0]  ;;  %1532 = vmatpush.bf16.msra.mxu2 %v3028_v8  ;;  %v2756_v16 = vor.u32 %v3932_v13, %v2755_v11 }
  0x23   :  { %v2884_v17 = vor.u32 %v3964_v15, %v2883_v14  ;;  %v3011_v18 = vld [vmem:[#allocation5 + $0x2c0] sm:$0xf]  ;;  %v3996_v19 = vld [vmem:[#allocation5 + $0x2cc] sm:$0xf0]  ;;  %1545 = vmatpush.bf16.msra.mxu3 %v3156_v12 }
  0x24   :  { %v3139_v20 = vld [vmem:[#allocation5 + $0x3c0] sm:$0xf]  ;;  %v3012_v21 = vor.u32 %v3996_v19, %v3011_v18  ;;  %v4028_v22 = vld [vmem:[#allocation5 + $0x3cc] sm:$0xf0]  ;;  %1507 = vmatpush.bf16.msra.mxu0 %v2756_v16 }
  0x25   :  { %v2739_v23 = vld [vmem:[#allocation5 + $0xa0] sm:$0xf]  ;;  %v3928_v24 = vld [vmem:[#allocation5 + $0xac] sm:$0xf0]  ;;  %v3140_v25 = vor.u32 %v4028_v22, %v3139_v20  ;;  %1520 = vmatpush.bf16.msra.mxu1 %v2884_v17 }
  0x26   :  { %v2867_v26 = vld [vmem:[#allocation5 + $0x1a0] sm:$0xf]  ;;  %v3960_v27 = vld [vmem:[#allocation5 + $0x1ac] sm:$0xf0]  ;;  %v2740_v29 = vor.u32 %v3928_v24, %v2739_v23  ;;  %1533 = vmatpush.bf16.msra.mxu2 %v3012_v21 }
  0x27   :  { %v2995_v28 = vld [vmem:[#allocation5 + $0x2a0] sm:$0xf]  ;;  %v3992_v30 = vld [vmem:[#allocation5 + $0x2ac] sm:$0xf0]  ;;  %v2868_v33 = vor.u32 %v3960_v27, %v2867_v26  ;;  %1546 = vmatpush.bf16.msra.mxu3 %v3140_v25 }
  0x28   :  { %v3123_v31 = vld [vmem:[#allocation5 + $0x3a0] sm:$0xf]  ;;  %v4024_v32 = vld [vmem:[#allocation5 + $0x3ac] sm:$0xf0]  ;;  %v2996_v34 = vor.u32 %v3992_v30, %v2995_v28  ;;  %1508 = vmatpush.bf16.msra.mxu0 %v2740_v29 }
  0x29   :  { %v2723_v35 = vld [vmem:[#allocation5 + $0x80] sm:$0xf]  ;;  %v3924_v36 = vld [vmem:[#allocation5 + $0x8c] sm:$0xf0]  ;;  %v3124_v38 = vor.u32 %v4024_v32, %v3123_v31  ;;  %1521 = vmatpush.bf16.msra.mxu1 %v2868_v33 }
  0x2a   :  { %v2851_v37 = vld [vmem:[#allocation5 + $0x180] sm:$0xf]  ;;  %v3956_v39 = vld [vmem:[#allocation5 + $0x18c] sm:$0xf0]  ;;  %v2724_v44 = vor.u32 %v3924_v36, %v2723_v35  ;;  %1534 = vmatpush.bf16.msra.mxu2 %v2996_v34 }
  0x2b   :  { %v2979_v40 = vld [vmem:[#allocation5 + $0x280] sm:$0xf]  ;;  %v3988_v41 = vld [vmem:[#allocation5 + $0x28c] sm:$0xf0]  ;;  %v2852_v45 = vor.u32 %v3956_v39, %v2851_v37  ;;  %1547 = vmatpush.bf16.msra.mxu3 %v3124_v38  ;;  %v3934_v37 = vld [vmem:[#allocation5 + $0xe4] sm:$0xf] }
  0x2c   :  { %v3107_v42 = vld [vmem:[#allocation5 + $0x380] sm:$0xf]  ;;  %v4020_v43 = vld [vmem:[#allocation5 + $0x38c] sm:$0xf0]  ;;  %v2980_v46 = vor.u32 %v3988_v41, %v2979_v40  ;;  %1509 = vmatpush.bf16.msra.mxu0 %v2724_v44  ;;  %v2773_v38 = vld [vmem:[#allocation5 + $0xf0] sm:$0xf0] }
  0x2d   :  { %v2707_v47 = vld [vmem:[#allocation5 + $0x60] sm:$0xf]  ;;  %v3920_v48 = vld [vmem:[#allocation5 + $0x6c] sm:$0xf0]  ;;  %v3108_v50 = vor.u32 %v4020_v43, %v3107_v42  ;;  %1522 = vmatpush.bf16.msra.mxu1 %v2852_v45 }
  0x2e   :  { %v2835_v49 = vld [vmem:[#allocation5 + $0x160] sm:$0xf]  ;;  %v3952_v51 = vld [vmem:[#allocation5 + $0x16c] sm:$0xf0]  ;;  %v2708_v56 = vor.u32 %v3920_v48, %v2707_v47  ;;  %1535 = vmatpush.bf16.msra.mxu2 %v2980_v46  ;;  %v2776_v46 = vor.u32 %v3934_v37, %v2773_v38 }
  0x2f   :  { %v2963_v52 = vld [vmem:[#allocation5 + $0x260] sm:$0xf]  ;;  %v3984_v53 = vld [vmem:[#allocation5 + $0x26c] sm:$0xf0]  ;;  %v2836_v57 = vor.u32 %v3952_v51, %v2835_v49  ;;  %1548 = vmatpush.bf16.msra.mxu3 %v3108_v50  ;;  %v3930_v50 = vld [vmem:[#allocation5 + $0xc4] sm:$0xf] }
  0x30   :  { %v3091_v54 = vld [vmem:[#allocation5 + $0x360] sm:$0xf]  ;;  %v4016_v55 = vld [vmem:[#allocation5 + $0x36c] sm:$0xf0]  ;;  %v2964_v58 = vor.u32 %v3984_v53, %v2963_v52  ;;  %1510 = vmatpush.bf16.msra.mxu0 %v2708_v56  ;;  %v2757_v51 = vld [vmem:[#allocation5 + $0xd0] sm:$0xf0] }
  0x31   :  { %v2691_v59 = vld [vmem:[#allocation5 + $0x40] sm:$0xf]  ;;  %v3916_v60 = vld [vmem:[#allocation5 + $0x4c] sm:$0xf0]  ;;  %v3092_v62 = vor.u32 %v4016_v55, %v3091_v54  ;;  %1523 = vmatpush.bf16.msra.mxu1 %v2836_v57 }
  0x32   :  { %v2819_v61 = vld [vmem:[#allocation5 + $0x140] sm:$0xf]  ;;  %v3948_v63 = vld [vmem:[#allocation5 + $0x14c] sm:$0xf0]  ;;  %v2692_v4 = vor.u32 %v3916_v60, %v2691_v59  ;;  %1536 = vmatpush.bf16.msra.mxu2 %v2964_v58  ;;  %v2760_v59 = vor.u32 %v3930_v50, %v2757_v51 }
  0x33   :  { %v2947_v0 = vld [vmem:[#allocation5 + $0x240] sm:$0xf]  ;;  %v3980_v1 = vld [vmem:[#allocation5 + $0x24c] sm:$0xf0]  ;;  %v2820_v5 = vor.u32 %v3948_v63, %v2819_v61  ;;  %1549 = vmatpush.bf16.msra.mxu3 %v3092_v62  ;;  %v3926_v62 = vld [vmem:[#allocation5 + $0xa4] sm:$0xf] }
  0x34   :  { %v3075_v2 = vld [vmem:[#allocation5 + $0x340] sm:$0xf]  ;;  %v4012_v3 = vld [vmem:[#allocation5 + $0x34c] sm:$0xf0]  ;;  %v2948_v6 = vor.u32 %v3980_v1, %v2947_v0  ;;  %1511 = vmatpush.bf16.msra.mxu0 %v2692_v4  ;;  %v2741_v63 = vld [vmem:[#allocation5 + $0xb0] sm:$0xf0] }
  0x35   :  { %v2675_v7 = vld [vmem:[#allocation5 + $0x20] sm:$0xf]  ;;  %v3912_v8 = vld [vmem:[#allocation5 + $0x2c] sm:$0xf0]  ;;  %v3076_v10 = vor.u32 %v4012_v3, %v3075_v2  ;;  %1524 = vmatpush.bf16.msra.mxu1 %v2820_v5  ;;  %v123_v3 = vld [vmem:[#allocation2] sm:$0xff] }
  0x36   :  { %v2803_v9 = vld [vmem:[#allocation5 + $0x120] sm:$0xf]  ;;  %v3944_v11 = vld [vmem:[#allocation5 + $0x12c] sm:$0xf0]  ;;  %v2676_v16 = vor.u32 %v3912_v8, %v2675_v7  ;;  %1537 = vmatpush.bf16.msra.mxu2 %v2948_v6 }
  0x37   :  { %v2931_v12 = vld [vmem:[#allocation5 + $0x220] sm:$0xf]  ;;  %v3976_v13 = vld [vmem:[#allocation5 + $0x22c] sm:$0xf0]  ;;  %v2804_v19 = vor.u32 %v3944_v11, %v2803_v9  ;;  %1550 = vmatpush.bf16.msra.mxu3 %v3076_v10  ;;  %v365_v9 = vunpack.c.l.b16 %v123_v3  ;;  %v2744_v11 = vor.u32 %v3926_v62, %v2741_v63 }
  0x38   :  { %v3059_v14 = vld [vmem:[#allocation5 + $0x320] sm:$0xf]  ;;  %v4008_v15 = vld [vmem:[#allocation5 + $0x32c] sm:$0xf0]  ;;  %v2932_v20 = vor.u32 %v3976_v13, %v2931_v12  ;;  %1512 = vmatpush.bf16.msra.mxu0 %v2676_v16  ;;  %v3922_v16 = vld [vmem:[#allocation5 + $0x84] sm:$0xf] }
  0x39   :  { %v2659_v17 = vld [vmem:[#allocation5] sm:$0xf]  ;;  %v3908_v18 = vld [vmem:[#allocation5 + $0xc] sm:$0xf0]  ;;  %v3060_v24 = vor.u32 %v4008_v15, %v3059_v14  ;;  %1525 = vmatpush.bf16.msra.mxu1 %v2804_v19  ;;  %v366_v15 = vunpack.c.h.b16 %v123_v3  ;;  %v4498_v19 = vpack.c.b16 %v365_v9, %v365_v9  ;;  %v126_v3 = vld [vmem:[#allocation2 + $0x18] sm:$0xf] }
  0x3a   :  { %v2787_v21 = vld [vmem:[#allocation5 + $0x100] sm:$0xf]  ;;  %v3940_v22 = vld [vmem:[#allocation5 + $0x10c] sm:$0xf0]  ;;  %v2660_v31 = vor.u32 %v3908_v18, %v2659_v17  ;;  %1538 = vmatpush.bf16.msra.mxu2 %v2932_v20  ;;  %v2725_v17 = vld [vmem:[#allocation5 + $0x90] sm:$0xf0] }
  0x3b   :  { %v2915_v23 = vld [vmem:[#allocation5 + $0x200] sm:$0xf]  ;;  %v3972_v25 = vld [vmem:[#allocation5 + $0x20c] sm:$0xf0]  ;;  %v2788_v35 = vor.u32 %v3940_v22, %v2787_v21  ;;  %1551 = vmatpush.bf16.msra.mxu3 %v3060_v24  ;;  %v4502_v22 = vpack.c.b16 %v366_v15, %v366_v15  ;;  %v2901_v9 = vld [vmem:[#allocation5 + $0x1f0] sm:$0xf0]  ;;  %v371_v15 = vunpack.c.l.b16 %v126_v3 }
  0x3c   :  { %v3043_v26 = vld [vmem:[#allocation5 + $0x300] sm:$0xf]  ;;  %v4004_v27 = vld [vmem:[#allocation5 + $0x30c] sm:$0xf0]  ;;  %v2916_v36 = vor.u32 %v3972_v25, %v2915_v23  ;;  %1513 = vmatpush.bf16.msra.mxu0 %v2660_v31 }
  0x3d   :  { %v3283_v28 = vld [vmem:[#allocation5 + $0x4e0] sm:$0xf]  ;;  %v4064_v29 = vld [vmem:[#allocation5 + $0x4ec] sm:$0xf0]  ;;  %v3044_v39 = vor.u32 %v4004_v27, %v3043_v26  ;;  %1526 = vmatpush.bf16.msra.mxu1 %v2788_v35 }
  0x3e   :  { %v3411_v30 = vld [vmem:[#allocation5 + $0x5e0] sm:$0xf]  ;;  %v4096_v32 = vld [vmem:[#allocation5 + $0x5ec] sm:$0xf0]  ;;  %v3284_v40 = vor.u32 %v4064_v29, %v3283_v28  ;;  %1539 = vmatpush.bf16.msra.mxu2 %v2916_v36  ;;  %v2728_v28 = vor.u32 %v3922_v16, %v2725_v17 }
  0x3f   :  { %v3539_v33 = vld [vmem:[#allocation5 + $0x6e0] sm:$0xf]  ;;  %v4128_v34 = vld [vmem:[#allocation5 + $0x6ec] sm:$0xf0]  ;;  %v3412_v41 = vor.u32 %v4096_v32, %v3411_v30  ;;  %1552 = vmatpush.bf16.msra.mxu3 %v3044_v39  ;;  %v3918_v32 = vld [vmem:[#allocation5 + $0x64] sm:$0xf]  ;;  %1514 = vmatmul.bf16.vlgmr.msra.gmra.mxu0 %v4498_v19 }
  0x40   :  { %v3540_v42 = vor.u32 %v4128_v34, %v3539_v33  ;;  %v3267_v43 = vld [vmem:[#allocation5 + $0x4c0] sm:$0xf]  ;;  %v4060_v44 = vld [vmem:[#allocation5 + $0x4cc] sm:$0xf0]  ;;  %1558 = vmatpush.bf16.msrb.mxu0 %v3284_v40  ;;  %v2709_v33 = vld [vmem:[#allocation5 + $0x70] sm:$0xf0]  ;;  %1527 = vmatmul.bf16.vlgmr.msra.gmra.mxu1 %v4502_v22 }
  0x41   :  { %v3395_v45 = vld [vmem:[#allocation5 + $0x5c0] sm:$0xf]  ;;  %v4092_v47 = vld [vmem:[#allocation5 + $0x5cc] sm:$0xf0]  ;;  %v3268_v52 = vor.u32 %v4060_v44, %v3267_v43  ;;  %1571 = vmatpush.bf16.msrb.mxu1 %v3412_v41  ;;  %v2712_v40 = vor.u32 %v3918_v32, %v2709_v33  ;;  %v3914_v44 = vld [vmem:[#allocation5 + $0x44] sm:$0xf] }
  0x42   :  { %v3523_v48 = vld [vmem:[#allocation5 + $0x6c0] sm:$0xf]  ;;  %v4124_v49 = vld [vmem:[#allocation5 + $0x6cc] sm:$0xf0]  ;;  %1584 = vmatpush.bf16.msrb.mxu2 %v3540_v42  ;;  %v3396_v54 = vor.u32 %v4092_v47, %v3395_v45  ;;  %v2693_v45 = vld [vmem:[#allocation5 + $0x50] sm:$0xf0] }
  0x43   :  { %v3251_v53 = vld [vmem:[#allocation5 + $0x4a0] sm:$0xf]  ;;  %v3524_v55 = vor.u32 %v4124_v49, %v3523_v48  ;;  %v4056_v56 = vld [vmem:[#allocation5 + $0x4ac] sm:$0xf0]  ;;  %1597 = vmatpush.bf16.msrb.mxu3 %v2776_v46  ;;  %v3994_v32 = vld [vmem:[#allocation5 + $0x2c4] sm:$0xf] }
  0x44   :  { %v3379_v57 = vld [vmem:[#allocation5 + $0x5a0] sm:$0xf]  ;;  %v4088_v58 = vld [vmem:[#allocation5 + $0x5ac] sm:$0xf0]  ;;  %1559 = vmatpush.bf16.msrb.mxu0 %v3268_v52  ;;  %v3252_v0 = vor.u32 %v4056_v56, %v3251_v53  ;;  %v2696_v52 = vor.u32 %v3914_v44, %v2693_v45  ;;  %v3910_v56 = vld [vmem:[#allocation5 + $0x24] sm:$0xf] }
  0x45   :  { %v3507_v60 = vld [vmem:[#allocation5 + $0x6a0] sm:$0xf]  ;;  %v4120_v61 = vld [vmem:[#allocation5 + $0x6ac] sm:$0xf0]  ;;  %v3380_v1 = vor.u32 %v4088_v58, %v3379_v57  ;;  %1572 = vmatpush.bf16.msrb.mxu1 %v3396_v54  ;;  %v2677_v57 = vld [vmem:[#allocation5 + $0x30] sm:$0xf0] }
  0x46   :  { %v124_v2 = vld [vmem:[#allocation2 + $0x8] sm:$0xff]  ;;  %1585 = vmatpush.bf16.msrb.mxu2 %v3524_v55  ;;  %v3508_v4 = vor.u32 %v4120_v61, %v3507_v60  ;;  %v3235_v5 = vld [vmem:[#allocation5 + $0x480] sm:$0xf]  ;;  %v3958_v45 = vld [vmem:[#allocation5 + $0x1a4] sm:$0xf] }
  0x47   :  { %v4052_v6 = vld [vmem:[#allocation5 + $0x48c] sm:$0xf0]  ;;  %v3363_v7 = vld [vmem:[#allocation5 + $0x580] sm:$0xf]  ;;  %v367_v8 = vunpack.c.l.b16 %v124_v2  ;;  %v368_v10 = vunpack.c.h.b16 %v124_v2  ;;  %1598 = vmatpush.bf16.msrb.mxu3 %v2760_v59 }
  0x48   :  { %v4084_v12 = vld [vmem:[#allocation5 + $0x58c] sm:$0xf0]  ;;  %v3491_v13 = vld [vmem:[#allocation5 + $0x680] sm:$0xf]  ;;  %1560 = vmatpush.bf16.msrb.mxu0 %v3252_v0  ;;  %v3236_v21 = vor.u32 %v4052_v6, %v3235_v5  ;;  %v3906_v5 = vld [vmem:[#allocation5 + $0x4] sm:$0xf] }
  0x49   :  { %v4116_v14 = vld [vmem:[#allocation5 + $0x68c] sm:$0xf0]  ;;  %v4496_v18 = vpack.c.b16 %v367_v8, %v367_v8  ;;  %v4500_v20 = vpack.c.b16 %v368_v10, %v368_v10  ;;  %1573 = vmatpush.bf16.msrb.mxu1 %v3380_v1  ;;  %v3364_v23 = vor.u32 %v4084_v12, %v3363_v7  ;;  %v3219_v25 = vld [vmem:[#allocation5 + $0x460] sm:$0xf]  ;;  %v2661_v6 = vld [vmem:[#allocation5 + $0x10] sm:$0xf0] }
  0x4a   :  { %1586 = vmatpush.bf16.msrb.mxu2 %v3508_v4  ;;  %v3492_v24 = vor.u32 %v4116_v14, %v3491_v13  ;;  %v4048_v26 = vld [vmem:[#allocation5 + $0x46c] sm:$0xf0]  ;;  %v3347_v27 = vld [vmem:[#allocation5 + $0x560] sm:$0xf]  ;;  %v2680_v4 = vor.u32 %v3910_v56, %v2677_v57  ;;  %v125_v7 = vld [vmem:[#allocation2 + $0x10] sm:$0xff] }
  0x4b   :  { %1599 = vmatpush.bf16.msrb.mxu3 %v2744_v11  ;;  %v4080_v29 = vld [vmem:[#allocation5 + $0x56c] sm:$0xf0]  ;;  %v3475_v30 = vld [vmem:[#allocation5 + $0x660] sm:$0xf]  ;;  %1540 = vmatmul.bf16.vlgmr.msra.gmra.mxu2 %v4496_v18  ;;  %v3220_v34 = vor.u32 %v4048_v26, %v3219_v25  ;;  %v3966_v8 = vld [vmem:[#allocation5 + $0x1e4] sm:$0xf]  ;;  %v370_v25 = vunpack.c.h.b16 %v125_v7  ;;  %v2664_v26 = vor.u32 %v3906_v5, %v2661_v6 }
  0x4c   :  { %v4112_v31 = vld [vmem:[#allocation5 + $0x66c] sm:$0xf0]  ;;  %1553 = vmatmul.bf16.vlgmr.msra.gmra.mxu3 %v4500_v20  ;;  %1561 = vmatpush.bf16.msrb.mxu0 %v3236_v21  ;;  %v3348_v35 = vor.u32 %v4080_v29, %v3347_v27  ;;  %v3203_v37 = vld [vmem:[#allocation5 + $0x440] sm:$0xf]  ;;  %v3998_v10 = vld [vmem:[#allocation5 + $0x2e4] sm:$0xf]  ;;  %v2904_v27 = vor.u32 %v3966_v8, %v2901_v9 }
  0x4d   :  { %1574 = vmatpush.bf16.msrb.mxu1 %v3364_v23  ;;  %v3476_v36 = vor.u32 %v4112_v31, %v3475_v30  ;;  %v4044_v38 = vld [vmem:[#allocation5 + $0x44c] sm:$0xf0]  ;;  %v3331_v39 = vld [vmem:[#allocation5 + $0x540] sm:$0xf]  ;;  %v3029_v12 = vld [vmem:[#allocation5 + $0x2f0] sm:$0xf0] }
  0x4e   :  { %1587 = vmatpush.bf16.msrb.mxu2 %v3492_v24  ;;  %v4076_v41 = vld [vmem:[#allocation5 + $0x54c] sm:$0xf0]  ;;  %v3459_v42 = vld [vmem:[#allocation5 + $0x640] sm:$0xf]  ;;  %v3204_v46 = vor.u32 %v4044_v38, %v3203_v37  ;;  %v4030_v13 = vld [vmem:[#allocation5 + $0x3e4] sm:$0xf]  ;;  %v369_v24 = vunpack.c.l.b16 %v125_v7  ;;  %v4508_v37 = vpack.c.b16 %v371_v15, %v371_v15 }
  0x4f   :  { %1600 = vmatpush.bf16.msrb.mxu3 %v2728_v28  ;;  %v4108_v43 = vld [vmem:[#allocation5 + $0x64c] sm:$0xf0]  ;;  %v3332_v47 = vor.u32 %v4076_v41, %v3331_v39  ;;  %v3187_v49 = vld [vmem:[#allocation5 + $0x420] sm:$0xf]  ;;  %v3157_v14 = vld [vmem:[#allocation5 + $0x3f0] sm:$0xf0]  ;;  %v3032_v28 = vor.u32 %v3998_v10, %v3029_v12  ;;  %v4512_v41 = vpack.c.b16 %v370_v25, %v370_v25 }
  0x50   :  { %1562 = vmatpush.bf16.msrb.mxu0 %v3220_v34  ;;  %v3460_v48 = vor.u32 %v4108_v43, %v3459_v42  ;;  %v4040_v50 = vld [vmem:[#allocation5 + $0x42c] sm:$0xf0]  ;;  %v3315_v51 = vld [vmem:[#allocation5 + $0x520] sm:$0xf]  ;;  %v4062_v21 = vld [vmem:[#allocation5 + $0x4e4] sm:$0xf]  ;;  %v3160_v29 = vor.u32 %v4030_v13, %v3157_v14 }
  0x51   :  { %1575 = vmatpush.bf16.msrb.mxu1 %v3348_v35  ;;  %v4072_v53 = vld [vmem:[#allocation5 + $0x52c] sm:$0xf0]  ;;  %v3443_v54 = vld [vmem:[#allocation5 + $0x620] sm:$0xf]  ;;  %v3188_v59 = vor.u32 %v4040_v50, %v3187_v49  ;;  %v3285_v23 = vld [vmem:[#allocation5 + $0x4f0] sm:$0xf0] }
  0x52   :  { %1588 = vmatpush.bf16.msrb.mxu2 %v3476_v36  ;;  %v4104_v55 = vld [vmem:[#allocation5 + $0x62c] sm:$0xf0]  ;;  %v3171_v58 = vld [vmem:[#allocation5 + $0x400] sm:$0xf]  ;;  %v3316_v63 = vor.u32 %v4072_v53, %v3315_v51  ;;  %v3962_v30 = vld [vmem:[#allocation5 + $0x1c4] sm:$0xf]  ;;  %v3288_v33 = vor.u32 %v4062_v21, %v3285_v23 }
  0x53   :  { %1601 = vmatpush.bf16.msrb.mxu3 %v2712_v40  ;;  %v4036_v60 = vld [vmem:[#allocation5 + $0x40c] sm:$0xf0]  ;;  %v3299_v61 = vld [vmem:[#allocation5 + $0x500] sm:$0xf]  ;;  %v3444_v0 = vor.u32 %v4104_v55, %v3443_v54  ;;  %v2885_v31 = vld [vmem:[#allocation5 + $0x1d0] sm:$0xf0]  ;;  %v4510_v40 = vpack.c.b16 %v369_v24, %v369_v24 }
  0x54   :  { %1563 = vmatpush.bf16.msrb.mxu0 %v3204_v46  ;;  %v4068_v62 = vld [vmem:[#allocation5 + $0x50c] sm:$0xf0]  ;;  %v3427_v1 = vld [vmem:[#allocation5 + $0x600] sm:$0xf]  ;;  %v3172_v11 = vor.u32 %v4036_v60, %v3171_v58  ;;  %v3013_v34 = vld [vmem:[#allocation5 + $0x2d0] sm:$0xf0]  ;;  %v2888_v42 = vor.u32 %v3962_v30, %v2885_v31 }
  0x55   :  { %1576 = vmatpush.bf16.msrb.mxu1 %v3332_v47  ;;  %v4100_v2 = vld [vmem:[#allocation5 + $0x60c] sm:$0xf0]  ;;  %v3300_v16 = vor.u32 %v4068_v62, %v3299_v61  ;;  %v4026_v35 = vld [vmem:[#allocation5 + $0x3c4] sm:$0xf]  ;;  %v3141_v36 = vld [vmem:[#allocation5 + $0x3d0] sm:$0xf0]  ;;  %v3016_v43 = vor.u32 %v3994_v32, %v3013_v34 }
  0x56   :  { %1589 = vmatpush.bf16.msrb.mxu2 %v3460_v48  ;;  %v3428_v17 = vor.u32 %v4100_v2, %v3427_v1  ;;  %v4058_v38 = vld [vmem:[#allocation5 + $0x4c4] sm:$0xf]  ;;  %v3269_v39 = vld [vmem:[#allocation5 + $0x4d0] sm:$0xf0]  ;;  %v3144_v44 = vor.u32 %v4026_v35, %v3141_v36 }
  0x57   :  { %1602 = vmatpush.bf16.msrb.mxu3 %v2696_v52  ;;  %v2869_v46 = vld [vmem:[#allocation5 + $0x1b0] sm:$0xf0]  ;;  %v3990_v47 = vld [vmem:[#allocation5 + $0x2a4] sm:$0xf]  ;;  %v3272_v48 = vor.u32 %v4058_v38, %v3269_v39 }
  0x58   :  { %1564 = vmatpush.bf16.msrb.mxu0 %v3188_v59  ;;  %v2997_v49 = vld [vmem:[#allocation5 + $0x2b0] sm:$0xf0]  ;;  %v4022_v50 = vld [vmem:[#allocation5 + $0x3a4] sm:$0xf]  ;;  %v2872_v54 = vor.u32 %v3958_v45, %v2869_v46 }
  0x59   :  { %1577 = vmatpush.bf16.msrb.mxu1 %v3316_v63  ;;  %v3125_v51 = vld [vmem:[#allocation5 + $0x3b0] sm:$0xf0]  ;;  %v4054_v52 = vld [vmem:[#allocation5 + $0x4a4] sm:$0xf]  ;;  %v3000_v55 = vor.u32 %v3990_v47, %v2997_v49 }
  0x5a   :  { %1590 = vmatpush.bf16.msrb.mxu2 %v3444_v0  ;;  %v3253_v53 = vld [vmem:[#allocation5 + $0x4b0] sm:$0xf0]  ;;  %v3128_v56 = vor.u32 %v4022_v50, %v3125_v51  ;;  %v3954_v57 = vld [vmem:[#allocation5 + $0x184] sm:$0xf] }
  0x5b   :  { %1603 = vmatpush.bf16.msrb.mxu3 %v2680_v4  ;;  %v2853_v58 = vld [vmem:[#allocation5 + $0x190] sm:$0xf0]  ;;  %v3986_v59 = vld [vmem:[#allocation5 + $0x284] sm:$0xf]  ;;  %v3256_v60 = vor.u32 %v4054_v52, %v3253_v53 }
  0x5c   :  { %1565 = vmatpush.bf16.msrb.mxu0 %v3172_v11  ;;  %v2981_v61 = vld [vmem:[#allocation5 + $0x290] sm:$0xf0]  ;;  %v4018_v62 = vld [vmem:[#allocation5 + $0x384] sm:$0xf]  ;;  %v2856_v2 = vor.u32 %v3954_v57, %v2853_v58 }
  0x5d   :  { %1578 = vmatpush.bf16.msrb.mxu1 %v3300_v16  ;;  %v3109_v63 = vld [vmem:[#allocation5 + $0x390] sm:$0xf0]  ;;  %v4050_v0 = vld [vmem:[#allocation5 + $0x484] sm:$0xf]  ;;  %v2984_v3 = vor.u32 %v3986_v59, %v2981_v61 }
  0x5e   :  { %1591 = vmatpush.bf16.msrb.mxu2 %v3428_v17  ;;  %v3237_v1 = vld [vmem:[#allocation5 + $0x490] sm:$0xf0]  ;;  %v3112_v4 = vor.u32 %v4018_v62, %v3109_v63  ;;  %v3950_v5 = vld [vmem:[#allocation5 + $0x164] sm:$0xf]  ;;  %v2779_v62 = vld [vmem:[#allocation5 + $0xe8] sm:$0xf] }
  0x5f   :  { %1604 = vmatpush.bf16.msrb.mxu3 %v2664_v26  ;;  %1566 = vmatmul.bf16.vlgmr.msrb.gmra.mxu0 %v4510_v40  ;;  %v2837_v6 = vld [vmem:[#allocation5 + $0x170] sm:$0xf0]  ;;  %v3982_v7 = vld [vmem:[#allocation5 + $0x264] sm:$0xf]  ;;  %v3240_v8 = vor.u32 %v4050_v0, %v3237_v1  ;;  %v3937_v63 = vld [vmem:[#allocation5 + $0xf4] sm:$0xf0] }
  0x60   :  { %1610 = vmatpush.bf16.msra.mxu0 %v2904_v27  ;;  %1579 = vmatmul.bf16.vlgmr.msrb.gmra.mxu1 %v4512_v41  ;;  %v2965_v9 = vld [vmem:[#allocation5 + $0x270] sm:$0xf0]  ;;  %v4014_v10 = vld [vmem:[#allocation5 + $0x364] sm:$0xf]  ;;  %v2840_v14 = vor.u32 %v3950_v5, %v2837_v6 }
  0x61   :  { %1623 = vmatpush.bf16.msra.mxu1 %v3032_v28  ;;  %1592 = vmatmul.bf16.vlgmr.msrb.gmra.mxu2 %v4508_v37  ;;  %v3093_v11 = vld [vmem:[#allocation5 + $0x370] sm:$0xf0]  ;;  %v4046_v12 = vld [vmem:[#allocation5 + $0x464] sm:$0xf]  ;;  %v2968_v15 = vor.u32 %v3982_v7, %v2965_v9  ;;  %v2780_v7 = vor.u32 %v3937_v63, %v2779_v62 }
  0x62   :  { %1636 = vmatpush.bf16.msra.mxu2 %v3160_v29  ;;  %1605 = vmatmul.bf16.vlgmr.msrb.gmra.mxu3 %v4498_v19  ;;  %v3221_v13 = vld [vmem:[#allocation5 + $0x470] sm:$0xf0]  ;;  %v3096_v16 = vor.u32 %v4014_v10, %v3093_v11  ;;  %v3946_v17 = vld [vmem:[#allocation5 + $0x144] sm:$0xf] }
  0x63   :  { %1649 = vmatpush.bf16.msra.mxu3 %v3288_v33  ;;  %v2821_v21 = vld [vmem:[#allocation5 + $0x150] sm:$0xf0]  ;;  %v3978_v23 = vld [vmem:[#allocation5 + $0x244] sm:$0xf]  ;;  %v3224_v24 = vor.u32 %v4046_v12, %v3221_v13  ;;  %v2763_v13 = vld [vmem:[#allocation5 + $0xc8] sm:$0xf] }
  0x64   :  { %1611 = vmatpush.bf16.msra.mxu0 %v2888_v42  ;;  %v2949_v25 = vld [vmem:[#allocation5 + $0x250] sm:$0xf0]  ;;  %v4010_v26 = vld [vmem:[#allocation5 + $0x344] sm:$0xf]  ;;  %v2824_v30 = vor.u32 %v3946_v17, %v2821_v21 }
  0x65   :  { %1624 = vmatpush.bf16.msra.mxu1 %v3016_v43  ;;  %v3077_v27 = vld [vmem:[#allocation5 + $0x350] sm:$0xf0]  ;;  %v4042_v28 = vld [vmem:[#allocation5 + $0x444] sm:$0xf]  ;;  %v2952_v31 = vor.u32 %v3978_v23, %v2949_v25 }
  0x66   :  { %1637 = vmatpush.bf16.msra.mxu2 %v3144_v44  ;;  %v3205_v29 = vld [vmem:[#allocation5 + $0x450] sm:$0xf0]  ;;  %v3080_v32 = vor.u32 %v4010_v26, %v3077_v27  ;;  %v3942_v33 = vld [vmem:[#allocation5 + $0x124] sm:$0xf] }
  0x67   :  { %1650 = vmatpush.bf16.msra.mxu3 %v3272_v48  ;;  %v2805_v34 = vld [vmem:[#allocation5 + $0x130] sm:$0xf0]  ;;  %v3974_v35 = vld [vmem:[#allocation5 + $0x224] sm:$0xf]  ;;  %v3208_v36 = vor.u32 %v4042_v28, %v3205_v29  ;;  %v2747_v29 = vld [vmem:[#allocation5 + $0xa8] sm:$0xf] }
  0x68   :  { %1612 = vmatpush.bf16.msra.mxu0 %v2872_v54  ;;  %v2933_v38 = vld [vmem:[#allocation5 + $0x230] sm:$0xf0]  ;;  %v4006_v39 = vld [vmem:[#allocation5 + $0x324] sm:$0xf]  ;;  %v2808_v45 = vor.u32 %v3942_v33, %v2805_v34 }
  0x69   :  { %1625 = vmatpush.bf16.msra.mxu1 %v3000_v55  ;;  %v3061_v42 = vld [vmem:[#allocation5 + $0x330] sm:$0xf0]  ;;  %v4038_v43 = vld [vmem:[#allocation5 + $0x424] sm:$0xf]  ;;  %v2936_v48 = vor.u32 %v3974_v35, %v2933_v38 }
  0x6a   :  { %1638 = vmatpush.bf16.msra.mxu2 %v3128_v56  ;;  %v3189_v44 = vld [vmem:[#allocation5 + $0x430] sm:$0xf0]  ;;  %v3938_v46 = vld [vmem:[#allocation5 + $0x104] sm:$0xf]  ;;  %v3064_v49 = vor.u32 %v4006_v39, %v3061_v42 }
  0x6b   :  { %1651 = vmatpush.bf16.msra.mxu3 %v3256_v60  ;;  %v2789_v47 = vld [vmem:[#allocation5 + $0x110] sm:$0xf0]  ;;  %v3970_v50 = vld [vmem:[#allocation5 + $0x204] sm:$0xf]  ;;  %v3192_v53 = vor.u32 %v4038_v43, %v3189_v44  ;;  %v2731_v44 = vld [vmem:[#allocation5 + $0x88] sm:$0xf] }
  0x6c   :  { %1613 = vmatpush.bf16.msra.mxu0 %v2856_v2  ;;  %v2917_v51 = vld [vmem:[#allocation5 + $0x210] sm:$0xf0]  ;;  %v4002_v52 = vld [vmem:[#allocation5 + $0x304] sm:$0xf]  ;;  %v2792_v60 = vor.u32 %v3938_v46, %v2789_v47  ;;  %v2907_v2 = vld [vmem:[#allocation5 + $0x1e8] sm:$0xf] }
  0x6d   :  { %1626 = vmatpush.bf16.msra.mxu1 %v2984_v3  ;;  %v3045_v54 = vld [vmem:[#allocation5 + $0x310] sm:$0xf0]  ;;  %v4034_v55 = vld [vmem:[#allocation5 + $0x404] sm:$0xf]  ;;  %v2920_v0 = vor.u32 %v3970_v50, %v2917_v51  ;;  %v3969_v3 = vld [vmem:[#allocation5 + $0x1f4] sm:$0xf0] }
  0x6e   :  { %1639 = vmatpush.bf16.msra.mxu2 %v3112_v4  ;;  %v3173_v56 = vld [vmem:[#allocation5 + $0x410] sm:$0xf0]  ;;  %v4094_v57 = vld [vmem:[#allocation5 + $0x5e4] sm:$0xf]  ;;  %v3048_v1 = vor.u32 %v4002_v52, %v3045_v54  ;;  %v2908_v11 = vor.u32 %v3969_v3, %v2907_v2  ;;  %v2859_v46 = vld [vmem:[#allocation5 + $0x188] sm:$0xf] }
  0x6f   :  { %1652 = vmatpush.bf16.msra.mxu3 %v3240_v8  ;;  %v3413_v58 = vld [vmem:[#allocation5 + $0x5f0] sm:$0xf0]  ;;  %v4126_v59 = vld [vmem:[#allocation5 + $0x6e4] sm:$0xf]  ;;  %v3176_v4 = vor.u32 %v4034_v55, %v3173_v56  ;;  %v3957_v47 = vld [vmem:[#allocation5 + $0x194] sm:$0xf0] }
  0x70   :  { %1614 = vmatpush.bf16.msra.mxu0 %v2840_v14  ;;  %v3541_v61 = vld [vmem:[#allocation5 + $0x6f0] sm:$0xf0]  ;;  %v3416_v5 = vor.u32 %v4094_v57, %v3413_v58  ;;  %v4090_v8 = vld [vmem:[#allocation5 + $0x5c4] sm:$0xf]  ;;  %v3933_v14 = vld [vmem:[#allocation5 + $0xd4] sm:$0xf0]  ;;  %v2860_v54 = vor.u32 %v3957_v47, %v2859_v46 }
  0x71   :  { %1627 = vmatpush.bf16.msra.mxu1 %v2968_v15  ;;  %v3544_v6 = vor.u32 %v4126_v59, %v3541_v61  ;;  %v3397_v9 = vld [vmem:[#allocation5 + $0x5d0] sm:$0xf0]  ;;  %v4122_v10 = vld [vmem:[#allocation5 + $0x6c4] sm:$0xf]  ;;  %v2891_v15 = vld [vmem:[#allocation5 + $0x1c8] sm:$0xf]  ;;  %v2764_v23 = vor.u32 %v3933_v14, %v2763_v13 }
  0x72   :  { %1640 = vmatpush.bf16.msra.mxu2 %v3096_v16  ;;  %v3525_v12 = vld [vmem:[#allocation5 + $0x6d0] sm:$0xf0]  ;;  %v3965_v16 = vld [vmem:[#allocation5 + $0x1d4] sm:$0xf0]  ;;  %v3400_v17 = vor.u32 %v4090_v8, %v3397_v9  ;;  %v4118_v26 = vld [vmem:[#allocation5 + $0x6a4] sm:$0xf] }
  0x73   :  { %1653 = vmatpush.bf16.msra.mxu3 %v3224_v24  ;;  %v3528_v21 = vor.u32 %v4122_v10, %v3525_v12  ;;  %v4086_v24 = vld [vmem:[#allocation5 + $0x5a4] sm:$0xf]  ;;  %v3381_v25 = vld [vmem:[#allocation5 + $0x5b0] sm:$0xf0]  ;;  %v2892_v27 = vor.u32 %v3965_v16, %v2891_v15  ;;  %v2715_v56 = vld [vmem:[#allocation5 + $0x68] sm:$0xf] }
  0x74   :  { %1615 = vmatpush.bf16.msra.mxu0 %v2824_v30  ;;  %v3509_v28 = vld [vmem:[#allocation5 + $0x6b0] sm:$0xf0]  ;;  %v3929_v30 = vld [vmem:[#allocation5 + $0xb4] sm:$0xf0]  ;;  %v3384_v33 = vor.u32 %v4086_v24, %v3381_v25  ;;  %v4114_v39 = vld [vmem:[#allocation5 + $0x684] sm:$0xf] }
  0x75   :  { %1628 = vmatpush.bf16.msra.mxu1 %v2952_v31  ;;  %v2875_v31 = vld [vmem:[#allocation5 + $0x1a8] sm:$0xf]  ;;  %v3512_v34 = vor.u32 %v4118_v26, %v3509_v28  ;;  %v2748_v35 = vor.u32 %v3929_v30, %v2747_v29  ;;  %v3365_v38 = vld [vmem:[#allocation5 + $0x590] sm:$0xf0]  ;;  %v4078_v51 = vld [vmem:[#allocation5 + $0x564] sm:$0xf] }
  0x76   :  { %1641 = vmatpush.bf16.msra.mxu2 %v3080_v32  ;;  %v3961_v32 = vld [vmem:[#allocation5 + $0x1b4] sm:$0xf0]  ;;  %v3493_v43 = vld [vmem:[#allocation5 + $0x690] sm:$0xf0]  ;;  %v2843_v58 = vld [vmem:[#allocation5 + $0x168] sm:$0xf] }
  0x77   :  { %1654 = vmatpush.bf16.msra.mxu3 %v3208_v36  ;;  %v4082_v36 = vld [vmem:[#allocation5 + $0x584] sm:$0xf]  ;;  %v2876_v42 = vor.u32 %v3961_v32, %v2875_v31  ;;  %v3349_v52 = vld [vmem:[#allocation5 + $0x570] sm:$0xf0]  ;;  %v3921_v57 = vld [vmem:[#allocation5 + $0x74] sm:$0xf0] }
  0x78   :  { %1616 = vmatpush.bf16.msra.mxu0 %v2808_v45  ;;  %v3925_v45 = vld [vmem:[#allocation5 + $0x94] sm:$0xf0]  ;;  %v3477_v55 = vld [vmem:[#allocation5 + $0x670] sm:$0xf0]  ;;  %v2716_v62 = vor.u32 %v3921_v57, %v2715_v56  ;;  %v4074_v63 = vld [vmem:[#allocation5 + $0x544] sm:$0xf] }
  0x79   :  { %1629 = vmatpush.bf16.msra.mxu1 %v2936_v48  ;;  %v3368_v48 = vor.u32 %v4082_v36, %v3365_v38  ;;  %v2732_v50 = vor.u32 %v3925_v45, %v2731_v44  ;;  %v3953_v59 = vld [vmem:[#allocation5 + $0x174] sm:$0xf0]  ;;  %v3461_v3 = vld [vmem:[#allocation5 + $0x650] sm:$0xf0]  ;;  %v4102_v13 = vld [vmem:[#allocation5 + $0x624] sm:$0xf] }
  0x7a   :  { %1642 = vmatpush.bf16.msra.mxu2 %v3064_v49  ;;  %v3496_v49 = vor.u32 %v4114_v39, %v3493_v43  ;;  %v2844_v2 = vor.u32 %v3953_v59, %v2843_v58  ;;  %v3317_v12 = vld [vmem:[#allocation5 + $0x530] sm:$0xf0]  ;;  %v2683_v16 = vld [vmem:[#allocation5 + $0x28] sm:$0xf]  ;;  %v4066_v25 = vld [vmem:[#allocation5 + $0x504] sm:$0xf] }
  0x7b   :  { %1655 = vmatpush.bf16.msra.mxu3 %v3192_v53  ;;  %v4110_v53 = vld [vmem:[#allocation5 + $0x664] sm:$0xf]  ;;  %v3445_v15 = vld [vmem:[#allocation5 + $0x630] sm:$0xf0]  ;;  %v2667_v31 = vld [vmem:[#allocation5 + $0x8] sm:$0xf] }
  0x7c   :  { %1617 = vmatpush.bf16.msra.mxu0 %v2792_v60  ;;  %v3352_v60 = vor.u32 %v4078_v51, %v3349_v52  ;;  %v3480_v61 = vor.u32 %v4110_v53, %v3477_v55  ;;  %v3301_v26 = vld [vmem:[#allocation5 + $0x510] sm:$0xf0]  ;;  %v4098_v29 = vld [vmem:[#allocation5 + $0x604] sm:$0xf]  ;;  %v3035_v36 = vld [vmem:[#allocation5 + $0x2e8] sm:$0xf] }
  0x7d   :  { %1630 = vmatpush.bf16.msra.mxu1 %v2920_v0  ;;  %v3333_v0 = vld [vmem:[#allocation5 + $0x550] sm:$0xf0]  ;;  %v4001_v38 = vld [vmem:[#allocation5 + $0x2f4] sm:$0xf0]  ;;  %v3163_v39 = vld [vmem:[#allocation5 + $0x3e8] sm:$0xf] }
  0x7e   :  { %1643 = vmatpush.bf16.msra.mxu2 %v3048_v1  ;;  %v4106_v1 = vld [vmem:[#allocation5 + $0x644] sm:$0xf]  ;;  %v3336_v8 = vor.u32 %v4074_v63, %v3333_v0  ;;  %v3429_v30 = vld [vmem:[#allocation5 + $0x610] sm:$0xf0]  ;;  %v4033_v43 = vld [vmem:[#allocation5 + $0x3f4] sm:$0xf0]  ;;  %v3036_v51 = vor.u32 %v4001_v38, %v3035_v36 }
  0x7f   :  { %1656 = vmatpush.bf16.msra.mxu3 %v3176_v4  ;;  %1618 = vmatmul.bf16.vlgmr.msra.gmra.mxu0 %v4502_v22  ;;  %v2699_v4 = vld [vmem:[#allocation5 + $0x48] sm:$0xf]  ;;  %v3464_v9 = vor.u32 %v4106_v1, %v3461_v3  ;;  %v4065_v45 = vld [vmem:[#allocation5 + $0x4f4] sm:$0xf0]  ;;  %v3432_v46 = vor.u32 %v4098_v29, %v3429_v30  ;;  %v3164_v52 = vor.u32 %v4033_v43, %v3163_v39 }
  0x80   :  { %1662 = vmatpush.bf16.msrb.mxu0 %v3416_v5  ;;  %1631 = vmatmul.bf16.vlgmr.msra.gmra.mxu1 %v4496_v18  ;;  %v3917_v5 = vld [vmem:[#allocation5 + $0x54] sm:$0xf0]  ;;  %v3291_v44 = vld [vmem:[#allocation5 + $0x4e8] sm:$0xf] }
  0x81   :  { %1675 = vmatpush.bf16.msrb.mxu1 %v3544_v6  ;;  %1644 = vmatmul.bf16.vlgmr.msra.gmra.mxu2 %v4500_v20  ;;  %v2827_v6 = vld [vmem:[#allocation5 + $0x148] sm:$0xf]  ;;  %v2700_v10 = vor.u32 %v3917_v5, %v2699_v4  ;;  %v3292_v53 = vor.u32 %v4065_v45, %v3291_v44  ;;  %v3997_v55 = vld [vmem:[#allocation5 + $0x2d4] sm:$0xf0] }
  0x82   :  { %1688 = vmatpush.bf16.msrb.mxu2 %v2780_v7  ;;  %1657 = vmatmul.bf16.vlgmr.msra.gmra.mxu3 %v4510_v40  ;;  %v3949_v7 = vld [vmem:[#allocation5 + $0x154] sm:$0xf0]  ;;  %v3147_v56 = vld [vmem:[#allocation5 + $0x3c8] sm:$0xf] }
  0x83   :  { %1701 = vmatpush.bf16.msrb.mxu3 %v2908_v11  ;;  %v4070_v11 = vld [vmem:[#allocation5 + $0x524] sm:$0xf]  ;;  %v2828_v14 = vor.u32 %v3949_v7, %v2827_v6  ;;  %v4029_v58 = vld [vmem:[#allocation5 + $0x3d4] sm:$0xf0]  ;;  %v3275_v59 = vld [vmem:[#allocation5 + $0x4c8] sm:$0xf] }
  0x84   :  { %1663 = vmatpush.bf16.msrb.mxu0 %v3400_v17  ;;  %v3913_v17 = vld [vmem:[#allocation5 + $0x34] sm:$0xf0]  ;;  %v3320_v24 = vor.u32 %v4070_v11, %v3317_v12  ;;  %v3148_v0 = vor.u32 %v4029_v58, %v3147_v56  ;;  %v3131_v4 = vld [vmem:[#allocation5 + $0x3a8] sm:$0xf] }
  0x85   :  { %1676 = vmatpush.bf16.msrb.mxu1 %v3528_v21  ;;  %v2811_v21 = vld [vmem:[#allocation5 + $0x128] sm:$0xf]  ;;  %v2684_v28 = vor.u32 %v3913_v17, %v2683_v16  ;;  %v3993_v3 = vld [vmem:[#allocation5 + $0x2b4] sm:$0xf0] }
  0x86   :  { %1689 = vmatpush.bf16.msrb.mxu2 %v2764_v23  ;;  %v3945_v23 = vld [vmem:[#allocation5 + $0x134] sm:$0xf0]  ;;  %v3259_v7 = vld [vmem:[#allocation5 + $0x4a8] sm:$0xf] }
  0x87   :  { %1702 = vmatpush.bf16.msrb.mxu3 %v2892_v27  ;;  %v3448_v27 = vor.u32 %v4102_v13, %v3445_v15  ;;  %v2812_v32 = vor.u32 %v3945_v23, %v2811_v21  ;;  %v4025_v6 = vld [vmem:[#allocation5 + $0x3b4] sm:$0xf0]  ;;  %v3115_v16 = vld [vmem:[#allocation5 + $0x388] sm:$0xf] }
  0x88   :  { %1664 = vmatpush.bf16.msrb.mxu0 %v3384_v33  ;;  %v3909_v33 = vld [vmem:[#allocation5 + $0x14] sm:$0xf0]  ;;  %v3132_v12 = vor.u32 %v4025_v6, %v3131_v4  ;;  %v3243_v23 = vld [vmem:[#allocation5 + $0x488] sm:$0xf] }
  0x89   :  { %1677 = vmatpush.bf16.msrb.mxu1 %v3512_v34  ;;  %v2795_v34 = vld [vmem:[#allocation5 + $0x108] sm:$0xf]  ;;  %v2668_v47 = vor.u32 %v3909_v33, %v2667_v31  ;;  %v3989_v15 = vld [vmem:[#allocation5 + $0x294] sm:$0xf0] }
  0x8a   :  { %1690 = vmatpush.bf16.msrb.mxu2 %v2748_v35  ;;  %v3941_v35 = vld [vmem:[#allocation5 + $0x114] sm:$0xf0]  ;;  %v2971_v30 = vld [vmem:[#allocation5 + $0x268] sm:$0xf] }
  0x8b   :  { %1703 = vmatpush.bf16.msrb.mxu3 %v2876_v42  ;;  %v3304_v42 = vor.u32 %v4066_v25, %v3301_v26  ;;  %v4021_v21 = vld [vmem:[#allocation5 + $0x394] sm:$0xf0]  ;;  %v3371_v25 = vld [vmem:[#allocation5 + $0x588] sm:$0xf] }
  0x8c   :  { %1665 = vmatpush.bf16.msrb.mxu0 %v3368_v48  ;;  %v3419_v48 = vld [vmem:[#allocation5 + $0x5e8] sm:$0xf]  ;;  %v4085_v26 = vld [vmem:[#allocation5 + $0x594] sm:$0xf0] }
  0x8d   :  { %1678 = vmatpush.bf16.msrb.mxu1 %v3496_v49  ;;  %v4097_v49 = vld [vmem:[#allocation5 + $0x5f4] sm:$0xf0]  ;;  %v3372_v33 = vor.u32 %v4085_v26, %v3371_v25  ;;  %v3355_v38 = vld [vmem:[#allocation5 + $0x568] sm:$0xf] }
  0x8e   :  { %1691 = vmatpush.bf16.msrb.mxu2 %v2732_v50  ;;  %v2796_v50 = vor.u32 %v3941_v35, %v2795_v34  ;;  %v3420_v57 = vor.u32 %v4097_v49, %v3419_v48  ;;  %v3985_v31 = vld [vmem:[#allocation5 + $0x274] sm:$0xf0]  ;;  %v3227_v35 = vld [vmem:[#allocation5 + $0x468] sm:$0xf] }
  0x8f   :  { %1704 = vmatpush.bf16.msrb.mxu3 %v2860_v54  ;;  %v3019_v54 = vld [vmem:[#allocation5 + $0x2c8] sm:$0xf]  ;;  %v4017_v34 = vld [vmem:[#allocation5 + $0x374] sm:$0xf0] }
  0x90   :  { %1666 = vmatpush.bf16.msrb.mxu0 %v3352_v60  ;;  %v4061_v60 = vld [vmem:[#allocation5 + $0x4d4] sm:$0xf0]  ;;  %v3020_v63 = vor.u32 %v3997_v55, %v3019_v54  ;;  %v2955_v45 = vld [vmem:[#allocation5 + $0x248] sm:$0xf] }
  0x91   :  { %1679 = vmatpush.bf16.msrb.mxu1 %v3480_v61  ;;  %v3403_v61 = vld [vmem:[#allocation5 + $0x5c8] sm:$0xf]  ;;  %v3276_v1 = vor.u32 %v4061_v60, %v3275_v59  ;;  %v4049_v36 = vld [vmem:[#allocation5 + $0x474] sm:$0xf0] }
  0x92   :  { %1692 = vmatpush.bf16.msrb.mxu2 %v2716_v62  ;;  %v4093_v62 = vld [vmem:[#allocation5 + $0x5d4] sm:$0xf0]  ;;  %v3228_v44 = vor.u32 %v4049_v36, %v3227_v35  ;;  %v3067_v59 = vld [vmem:[#allocation5 + $0x328] sm:$0xf]  ;;  %v3931_v35 = vld [vmem:[#allocation5 + $0xcc] sm:$0xf] }
  0x93   :  { %1705 = vmatpush.bf16.msrb.mxu3 %v2844_v2  ;;  %v3003_v2 = vld [vmem:[#allocation5 + $0x2a8] sm:$0xf]  ;;  %v3404_v5 = vor.u32 %v4093_v62, %v3403_v61  ;;  %v4081_v39 = vld [vmem:[#allocation5 + $0x574] sm:$0xf0] }
  0x94   :  { %1667 = vmatpush.bf16.msrb.mxu0 %v3336_v8  ;;  %v4057_v8 = vld [vmem:[#allocation5 + $0x4b4] sm:$0xf0]  ;;  %v3004_v11 = vor.u32 %v3993_v3, %v3003_v2  ;;  %v3356_v48 = vor.u32 %v4081_v39, %v3355_v38  ;;  %v3195_v62 = vld [vmem:[#allocation5 + $0x428] sm:$0xf]  ;;  %v2765_v38 = vld [vmem:[#allocation5 + $0xd8] sm:$0xf0] }
  0x95   :  { %1680 = vmatpush.bf16.msrb.mxu1 %v3464_v9  ;;  %v3387_v9 = vld [vmem:[#allocation5 + $0x5a8] sm:$0xf]  ;;  %v3260_v13 = vor.u32 %v4057_v8, %v3259_v7  ;;  %v4013_v49 = vld [vmem:[#allocation5 + $0x354] sm:$0xf0]  ;;  %v3963_v39 = vld [vmem:[#allocation5 + $0x1cc] sm:$0xf] }
  0x96   :  { %1693 = vmatpush.bf16.msrb.mxu2 %v2700_v10  ;;  %v4089_v10 = vld [vmem:[#allocation5 + $0x5b4] sm:$0xf0]  ;;  %v2923_v3 = vld [vmem:[#allocation5 + $0x208] sm:$0xf] }
  0x97   :  { %1706 = vmatpush.bf16.msrb.mxu3 %v2828_v14  ;;  %v2987_v14 = vld [vmem:[#allocation5 + $0x288] sm:$0xf]  ;;  %v3388_v17 = vor.u32 %v4089_v10, %v3387_v9  ;;  %v3977_v58 = vld [vmem:[#allocation5 + $0x234] sm:$0xf0] }
  0x98   :  { %1668 = vmatpush.bf16.msrb.mxu0 %v3320_v24  ;;  %v4053_v24 = vld [vmem:[#allocation5 + $0x494] sm:$0xf0]  ;;  %v3051_v7 = vld [vmem:[#allocation5 + $0x308] sm:$0xf] }
  0x99   :  { %1681 = vmatpush.bf16.msrb.mxu1 %v3448_v27  ;;  %v2988_v27 = vor.u32 %v3989_v15, %v2987_v14  ;;  %v3244_v29 = vor.u32 %v4053_v24, %v3243_v23  ;;  %v4009_v61 = vld [vmem:[#allocation5 + $0x334] sm:$0xf0]  ;;  %v3179_v9 = vld [vmem:[#allocation5 + $0x408] sm:$0xf]  ;;  %v3967_v23 = vld [vmem:[#allocation5 + $0x1ec] sm:$0xf] }
  0x9a   :  { %1694 = vmatpush.bf16.msrb.mxu2 %v2684_v28  ;;  %v3116_v28 = vor.u32 %v4021_v21, %v3115_v16  ;;  %v3973_v4 = vld [vmem:[#allocation5 + $0x214] sm:$0xf0]  ;;  %v3547_v14 = vld [vmem:[#allocation5 + $0x6e8] sm:$0xf]  ;;  %v3935_v16 = vld [vmem:[#allocation5 + $0xec] sm:$0xf] }
  0x9b   :  { %1707 = vmatpush.bf16.msrb.mxu3 %v2812_v32  ;;  %v3099_v32 = vld [vmem:[#allocation5 + $0x368] sm:$0xf]  ;;  %v4005_v8 = vld [vmem:[#allocation5 + $0x314] sm:$0xf0]  ;;  %v2781_v21 = vld [vmem:[#allocation5 + $0xf8] sm:$0xf0] }
  0x9c   :  { %1669 = vmatpush.bf16.msrb.mxu0 %v3304_v42  ;;  %v2972_v42 = vor.u32 %v3985_v31, %v2971_v30  ;;  %v3100_v43 = vor.u32 %v4017_v34, %v3099_v32  ;;  %v4129_v15 = vld [vmem:[#allocation5 + $0x6f4] sm:$0xf0]  ;;  %v2909_v24 = vld [vmem:[#allocation5 + $0x1f8] sm:$0xf0]  ;;  %v3052_v25 = vor.u32 %v4005_v8, %v3051_v7  ;;  %v2784_v31 = vor.u32 %v3935_v16, %v2781_v21  ;;  %v3483_v8 = vld [vmem:[#allocation5 + $0x668] sm:$0xf] }
  0x9d   :  { %1682 = vmatpush.bf16.msrb.mxu1 %v3432_v46  ;;  %v3981_v46 = vld [vmem:[#allocation5 + $0x254] sm:$0xf0]  ;;  %v3548_v30 = vor.u32 %v4129_v15, %v3547_v14  ;;  %v2912_v32 = vor.u32 %v3967_v23, %v2909_v24  ;;  %v2845_v14 = vld [vmem:[#allocation5 + $0x178] sm:$0xf0]  ;;  %v3983_v15 = vld [vmem:[#allocation5 + $0x26c] sm:$0xf] }
  0x9e   :  { %1695 = vmatpush.bf16.msrb.mxu2 %v2668_v47  ;;  %v3083_v47 = vld [vmem:[#allocation5 + $0x348] sm:$0xf]  ;;  %v2956_v54 = vor.u32 %v3981_v46, %v2955_v45  ;;  %v4125_v34 = vld [vmem:[#allocation5 + $0x6d4] sm:$0xf0]  ;;  %v2768_v46 = vor.u32 %v3931_v35, %v2765_v38  ;;  %v2973_v16 = vld [vmem:[#allocation5 + $0x278] sm:$0xf0] }
  0x9f   :  { %1708 = vmatpush.bf16.msrb.mxu3 %v2796_v50  ;;  %1670 = vmatmul.bf16.vlgmr.msrb.gmra.mxu0 %v4512_v41  ;;  %v3211_v50 = vld [vmem:[#allocation5 + $0x448] sm:$0xf]  ;;  %v3084_v55 = vor.u32 %v4013_v49, %v3083_v47  ;;  %v4121_v49 = vld [vmem:[#allocation5 + $0x6b4] sm:$0xf0] }
  0xa0   :  { %1714 = vmatpush.bf16.msra.mxu0 %v3036_v51  ;;  %1683 = vmatmul.bf16.vlgmr.msrb.gmra.mxu1 %v4508_v37  ;;  %v4045_v51 = vld [vmem:[#allocation5 + $0x454] sm:$0xf0]  ;;  %v3467_v24 = vld [vmem:[#allocation5 + $0x648] sm:$0xf] }
  0xa1   :  { %1727 = vmatpush.bf16.msra.mxu1 %v3164_v52  ;;  %1696 = vmatmul.bf16.vlgmr.msrb.gmra.mxu2 %v4498_v19  ;;  %v3339_v52 = vld [vmem:[#allocation5 + $0x548] sm:$0xf]  ;;  %v3212_v56 = vor.u32 %v4045_v51, %v3211_v50  ;;  %v3927_v50 = vld [vmem:[#allocation5 + $0xac] sm:$0xf] }
  0xa2   :  { %1740 = vmatpush.bf16.msra.mxu2 %v3292_v53  ;;  %1709 = vmatmul.bf16.vlgmr.msrb.gmra.mxu3 %v4502_v22  ;;  %v4077_v53 = vld [vmem:[#allocation5 + $0x554] sm:$0xf0]  ;;  %v3451_v38 = vld [vmem:[#allocation5 + $0x628] sm:$0xf] }
  0xa3   :  { %1753 = vmatpush.bf16.msra.mxu3 %v3420_v57  ;;  %v2939_v57 = vld [vmem:[#allocation5 + $0x228] sm:$0xf]  ;;  %v3340_v60 = vor.u32 %v4077_v53, %v3339_v52  ;;  %v2749_v52 = vld [vmem:[#allocation5 + $0xb8] sm:$0xf0]  ;;  %v3959_v53 = vld [vmem:[#allocation5 + $0x1ac] sm:$0xf] }
  0xa4   :  { %1715 = vmatpush.bf16.msra.mxu0 %v3020_v63  ;;  %v4041_v63 = vld [vmem:[#allocation5 + $0x434] sm:$0xf0]  ;;  %v2940_v2 = vor.u32 %v3977_v58, %v2939_v57  ;;  %v2752_v58 = vor.u32 %v3927_v50, %v2749_v52 }
  0xa5   :  { %1728 = vmatpush.bf16.msra.mxu1 %v3148_v0  ;;  %v3323_v0 = vld [vmem:[#allocation5 + $0x528] sm:$0xf]  ;;  %v3196_v6 = vor.u32 %v4041_v63, %v3195_v62  ;;  %v3923_v62 = vld [vmem:[#allocation5 + $0x8c] sm:$0xf]  ;;  %v4101_v52 = vld [vmem:[#allocation5 + $0x614] sm:$0xf0] }
  0xa6   :  { %1741 = vmatpush.bf16.msra.mxu2 %v3276_v1  ;;  %v4073_v1 = vld [vmem:[#allocation5 + $0x534] sm:$0xf0] }
  0xa7   :  { %1754 = vmatpush.bf16.msra.mxu3 %v3404_v5  ;;  %v3068_v5 = vor.u32 %v4009_v61, %v3067_v59  ;;  %v3324_v10 = vor.u32 %v4073_v1, %v3323_v0  ;;  %v4117_v61 = vld [vmem:[#allocation5 + $0x694] sm:$0xf0]  ;;  %v2733_v0 = vld [vmem:[#allocation5 + $0x98] sm:$0xf0]  ;;  %v3955_v1 = vld [vmem:[#allocation5 + $0x18c] sm:$0xf] }
  0xa8   :  { %1716 = vmatpush.bf16.msra.mxu0 %v3004_v11  ;;  %v4037_v11 = vld [vmem:[#allocation5 + $0x414] sm:$0xf0] }
  0xa9   :  { %1729 = vmatpush.bf16.msra.mxu1 %v3132_v12  ;;  %v3307_v12 = vld [vmem:[#allocation5 + $0x508] sm:$0xf]  ;;  %v3180_v26 = vor.u32 %v4037_v11, %v3179_v9  ;;  %v4113_v9 = vld [vmem:[#allocation5 + $0x674] sm:$0xf0] }
  0xaa   :  { %1742 = vmatpush.bf16.msra.mxu2 %v3260_v13  ;;  %v4069_v13 = vld [vmem:[#allocation5 + $0x514] sm:$0xf0] }
  0xab   :  { %1755 = vmatpush.bf16.msra.mxu3 %v3388_v17  ;;  %v2924_v17 = vor.u32 %v3973_v4, %v2923_v3  ;;  %v3987_v3 = vld [vmem:[#allocation5 + $0x28c] sm:$0xf]  ;;  %v2989_v4 = vld [vmem:[#allocation5 + $0x298] sm:$0xf0] }
  0xac   :  { %1717 = vmatpush.bf16.msra.mxu0 %v2988_v27  ;;  %v3999_v27 = vld [vmem:[#allocation5 + $0x2ec] sm:$0xf]  ;;  %v2992_v11 = vor.u32 %v3987_v3, %v2989_v4  ;;  %v3293_v4 = vld [vmem:[#allocation5 + $0x4f8] sm:$0xf0] }
  0xad   :  { %1730 = vmatpush.bf16.msra.mxu1 %v3116_v28  ;;  %v3037_v28 = vld [vmem:[#allocation5 + $0x2f8] sm:$0xf0] }
  0xae   :  { %1743 = vmatpush.bf16.msra.mxu2 %v3244_v29  ;;  %v3308_v29 = vor.u32 %v4069_v13, %v3307_v12  ;;  %v3040_v36 = vor.u32 %v3999_v27, %v3037_v28  ;;  %v2717_v12 = vld [vmem:[#allocation5 + $0x78] sm:$0xf0]  ;;  %v3951_v13 = vld [vmem:[#allocation5 + $0x16c] sm:$0xf]  ;;  %v2976_v27 = vor.u32 %v3983_v15, %v2973_v16 }
  0xaf   :  { %1756 = vmatpush.bf16.msra.mxu3 %v3372_v33  ;;  %v3531_v33 = vld [vmem:[#allocation5 + $0x6c8] sm:$0xf]  ;;  %v2848_v23 = vor.u32 %v3951_v13, %v2845_v14  ;;  %v2701_v28 = vld [vmem:[#allocation5 + $0x58] sm:$0xf0] }
  0xb0   :  { %1718 = vmatpush.bf16.msra.mxu0 %v2972_v42  ;;  %v2893_v42 = vld [vmem:[#allocation5 + $0x1d8] sm:$0xf0]  ;;  %v3532_v45 = vor.u32 %v4125_v34, %v3531_v33 }
  0xb1   :  { %1731 = vmatpush.bf16.msra.mxu1 %v3100_v43  ;;  %v3995_v43 = vld [vmem:[#allocation5 + $0x2cc] sm:$0xf]  ;;  %v2896_v47 = vor.u32 %v3963_v39, %v2893_v42  ;;  %v4105_v39 = vld [vmem:[#allocation5 + $0x634] sm:$0xf0] }
  0xb2   :  { %1744 = vmatpush.bf16.msra.mxu2 %v3228_v44  ;;  %v3021_v44 = vld [vmem:[#allocation5 + $0x2d8] sm:$0xf0]  ;;  %v3911_v42 = vld [vmem:[#allocation5 + $0x2c] sm:$0xf]  ;;  %v3452_v50 = vor.u32 %v4105_v39, %v3451_v38 }
  0xb3   :  { %1757 = vmatpush.bf16.msra.mxu3 %v3356_v48  ;;  %v3515_v48 = vld [vmem:[#allocation5 + $0x6a8] sm:$0xf]  ;;  %v3024_v51 = vor.u32 %v3995_v43, %v3021_v44  ;;  %v3133_v38 = vld [vmem:[#allocation5 + $0x3b8] sm:$0xf0]  ;;  %v4055_v39 = vld [vmem:[#allocation5 + $0x4ac] sm:$0xf] }
  0xb4   :  { %1719 = vmatpush.bf16.msra.mxu0 %v2956_v54  ;;  %v2877_v54 = vld [vmem:[#allocation5 + $0x1b8] sm:$0xf0]  ;;  %v3516_v57 = vor.u32 %v4121_v49, %v3515_v48  ;;  %v3975_v48 = vld [vmem:[#allocation5 + $0x22c] sm:$0xf] }
  0xb5   :  { %1732 = vmatpush.bf16.msra.mxu1 %v3084_v55  ;;  %v3991_v55 = vld [vmem:[#allocation5 + $0x2ac] sm:$0xf]  ;;  %v2880_v59 = vor.u32 %v3959_v53, %v2877_v54  ;;  %v2941_v49 = vld [vmem:[#allocation5 + $0x238] sm:$0xf0] }
  0xb6   :  { %1745 = vmatpush.bf16.msra.mxu2 %v3212_v56  ;;  %v3005_v56 = vld [vmem:[#allocation5 + $0x2b8] sm:$0xf0] }
  0xb7   :  { %1758 = vmatpush.bf16.msra.mxu3 %v3340_v60  ;;  %v3499_v60 = vld [vmem:[#allocation5 + $0x688] sm:$0xf]  ;;  %v3008_v63 = vor.u32 %v3991_v55, %v3005_v56  ;;  %v3907_v55 = vld [vmem:[#allocation5 + $0xc] sm:$0xf]  ;;  %v2669_v56 = vld [vmem:[#allocation5 + $0x18] sm:$0xf0] }
  0xb8   :  { %1720 = vmatpush.bf16.msra.mxu0 %v2940_v2  ;;  %v2861_v2 = vld [vmem:[#allocation5 + $0x198] sm:$0xf0] }
  0xb9   :  { %1733 = vmatpush.bf16.msra.mxu1 %v3068_v5  ;;  %v3500_v5 = vor.u32 %v4117_v61, %v3499_v60  ;;  %v2864_v7 = vor.u32 %v3955_v1, %v2861_v2  ;;  %v2797_v60 = vld [vmem:[#allocation5 + $0x118] sm:$0xf0]  ;;  %v3971_v61 = vld [vmem:[#allocation5 + $0x20c] sm:$0xf] }
  0xba   :  { %1746 = vmatpush.bf16.msra.mxu2 %v3196_v6  ;;  %v2736_v6 = vor.u32 %v3923_v62, %v2733_v0  ;;  %v2925_v62 = vld [vmem:[#allocation5 + $0x218] sm:$0xf0]  ;;  %v4031_v0 = vld [vmem:[#allocation5 + $0x3ec] sm:$0xf] }
  0xbb   :  { %1759 = vmatpush.bf16.msra.mxu3 %v3324_v10  ;;  %v3919_v10 = vld [vmem:[#allocation5 + $0x6c] sm:$0xf]  ;;  %v3165_v1 = vld [vmem:[#allocation5 + $0x3f8] sm:$0xf0]  ;;  %v2928_v13 = vor.u32 %v3971_v61, %v2925_v62 }
  0xbc   :  { %1721 = vmatpush.bf16.msra.mxu0 %v2924_v17  ;;  %v3484_v17 = vor.u32 %v4113_v9, %v3483_v8  ;;  %v2720_v21 = vor.u32 %v3919_v10, %v2717_v12  ;;  %v4530_v34 = vpop.f32.mrf.mxu0  ;;  %v4063_v2 = vld [vmem:[#allocation5 + $0x4ec] sm:$0xf]  ;;  %v2672_v8 = vor.u32 %v3907_v55, %v2669_v56  ;;  %v3168_v14 = vor.u32 %v4031_v0, %v3165_v1  ;;  %v3245_v56 = vld [vmem:[#allocation5 + $0x498] sm:$0xf0] }
  0xbd   :  { %1734 = vmatpush.bf16.msra.mxu1 %v3052_v25  ;;  %v4109_v25 = vld [vmem:[#allocation5 + $0x654] sm:$0xf0]  ;;  %v4532_v43 = vpop.f32.mrf.mxu1  ;;  %v4127_v10 = vld [vmem:[#allocation5 + $0x6ec] sm:$0xf]  ;;  %v3296_v15 = vor.u32 %v4063_v2, %v3293_v4  ;;  %v3101_v2 = vld [vmem:[#allocation5 + $0x378] sm:$0xf0] }
  0xbe   :  { %1747 = vmatpush.bf16.msra.mxu2 %v3180_v26  ;;  %v3915_v26 = vld [vmem:[#allocation5 + $0x4c] sm:$0xf]  ;;  %v3468_v33 = vor.u32 %v4109_v25, %v3467_v24  ;;  %v3277_v25 = vld [vmem:[#allocation5 + $0x4d8] sm:$0xf0] }
  0xbf   :  { %1760 = vmatpush.bf16.msra.mxu3 %v3308_v29  ;;  %1722 = vmatmul.bf16.vlgmr.msra.gmra.mxu0 %v4496_v18  ;;  %v3947_v29 = vld [vmem:[#allocation5 + $0x14c] sm:$0xf]  ;;  %v2704_v35 = vor.u32 %v3915_v26, %v2701_v28 }
  0xc0   :  { %1766 = vmatpush.bf16.msrb.mxu0 %v3548_v30  ;;  %1735 = vmatmul.bf16.vlgmr.msra.gmra.mxu1 %v4500_v20  ;;  %v2829_v30 = vld [vmem:[#allocation5 + $0x158] sm:$0xf0]  ;;  %v4091_v26 = vld [vmem:[#allocation5 + $0x5cc] sm:$0xf] }
  0xc1   :  { %1779 = vmatpush.bf16.msrb.mxu1 %v2784_v31  ;;  %1748 = vmatmul.bf16.vlgmr.msra.gmra.mxu2 %v4510_v40  ;;  %v3979_v31 = vld [vmem:[#allocation5 + $0x24c] sm:$0xf] }
  0xc2   :  { %1792 = vmatpush.bf16.msrb.mxu2 %v2912_v32  ;;  %1761 = vmatmul.bf16.vlgmr.msra.gmra.mxu3 %v4512_v41  ;;  %v2957_v32 = vld [vmem:[#allocation5 + $0x258] sm:$0xf0]  ;;  %v4123_v28 = vld [vmem:[#allocation5 + $0x6cc] sm:$0xf] }
  0xc3   :  { %1805 = vmatpush.bf16.msrb.mxu3 %v3040_v36  ;;  %v2832_v36 = vor.u32 %v3947_v29, %v2829_v30  ;;  %v2960_v44 = vor.u32 %v3979_v31, %v2957_v32  ;;  %v3533_v29 = vld [vmem:[#allocation5 + $0x6d8] sm:$0xf0]  ;;  %v4015_v1 = vld [vmem:[#allocation5 + $0x36c] sm:$0xf] }
  0xc4   :  { %1767 = vmatpush.bf16.msrb.mxu0 %v3532_v45  ;;  %v2685_v45 = vld [vmem:[#allocation5 + $0x38] sm:$0xf0] }
  0xc5   :  { %1780 = vmatpush.bf16.msrb.mxu1 %v2768_v46  ;;  %v3943_v46 = vld [vmem:[#allocation5 + $0x12c] sm:$0xf]  ;;  %v2688_v53 = vor.u32 %v3911_v42, %v2685_v45  ;;  %v1530_v12 = vpop.f32.mrf.mxu1  ;;  %v3536_v42 = vor.u32 %v4123_v28, %v3533_v29  ;;  %v4550_v28 = vld [vmem:[#allocation7] sm:$0xf] }
  0xc6   :  { %1793 = vmatpush.bf16.msrb.mxu2 %v2896_v47  ;;  %v2813_v47 = vld [vmem:[#allocation5 + $0x138] sm:$0xf0]  ;;  %v4087_v45 = vld [vmem:[#allocation5 + $0x5ac] sm:$0xf] }
  0xc7   :  { %1806 = vmatpush.bf16.msrb.mxu3 %v3024_v51  ;;  %v3435_v51 = vld [vmem:[#allocation5 + $0x608] sm:$0xf]  ;;  %v2816_v54 = vor.u32 %v3943_v46, %v2813_v47  ;;  %v3389_v46 = vld [vmem:[#allocation5 + $0x5b8] sm:$0xf0]  ;;  %v4119_v47 = vld [vmem:[#allocation5 + $0x6ac] sm:$0xf] }
  0xc8   :  { %1768 = vmatpush.bf16.msrb.mxu0 %v3516_v57  ;;  %v3939_v57 = vld [vmem:[#allocation5 + $0x10c] sm:$0xf]  ;;  %v3436_v3 = vor.u32 %v4101_v52, %v3435_v51  ;;  %v3392_v51 = vor.u32 %v4087_v45, %v3389_v46  ;;  %v3325_v45 = vld [vmem:[#allocation5 + $0x538] sm:$0xf0] }
  0xc9   :  { %1781 = vmatpush.bf16.msrb.mxu1 %v2752_v58  ;;  %v2800_v9 = vor.u32 %v3939_v57, %v2797_v60  ;;  %v4019_v52 = vld [vmem:[#allocation5 + $0x38c] sm:$0xf]  ;;  %v3501_v60 = vld [vmem:[#allocation5 + $0x698] sm:$0xf0] }
  0xca   :  { %1794 = vmatpush.bf16.msrb.mxu2 %v2880_v59  ;;  %v2944_v59 = vor.u32 %v3975_v48, %v2941_v49  ;;  %v3517_v48 = vld [vmem:[#allocation5 + $0x6b8] sm:$0xf0]  ;;  %v4083_v57 = vld [vmem:[#allocation5 + $0x58c] sm:$0xf] }
  0xcb   :  { %1807 = vmatpush.bf16.msrb.mxu3 %v3008_v63  ;;  %v3520_v55 = vor.u32 %v4119_v47, %v3517_v48  ;;  %v4103_v46 = vld [vmem:[#allocation5 + $0x62c] sm:$0xf]  ;;  %v3453_v47 = vld [vmem:[#allocation5 + $0x638] sm:$0xf0]  ;;  %v353_v48 = vperm.slane %v4550_v28, 0 }
  0xcc   :  { %1769 = vmatpush.bf16.msrb.mxu0 %v3500_v5  ;;  %v4095_v5 = vld [vmem:[#allocation5 + $0x5ec] sm:$0xf] }
  0xcd   :  { %1782 = vmatpush.bf16.msrb.mxu1 %v2736_v6  ;;  %v3421_v6 = vld [vmem:[#allocation5 + $0x5f8] sm:$0xf0] }
  0xce   :  { %1795 = vmatpush.bf16.msrb.mxu2 %v2864_v7  ;;  %v4534_v58 = vpop.f32.mrf.mxu2  ;;  %v1517_v7 = vpop.f32.mrf.mxu0  ;;  %v3424_v16 = vor.u32 %v4095_v5, %v3421_v6  ;;  %v3229_v5 = vld [vmem:[#allocation5 + $0x478] sm:$0xf0]  ;;  %v4079_v6 = vld [vmem:[#allocation5 + $0x56c] sm:$0xf] }
  0xcf   :  { %1808 = vmatpush.bf16.msrb.mxu3 %v2992_v11  ;;  %v4536_v63 = vpop.f32.mrf.mxu3  ;;  %v3549_v11 = vld [vmem:[#allocation5 + $0x6f8] sm:$0xf0] }
  0xd0   :  { %1770 = vmatpush.bf16.msrb.mxu0 %v3484_v17  ;;  %v4027_v17 = vld [vmem:[#allocation5 + $0x3cc] sm:$0xf]  ;;  %v3552_v24 = vor.u32 %v4127_v10, %v3549_v11  ;;  %v3357_v7 = vld [vmem:[#allocation5 + $0x578] sm:$0xf0]  ;;  %v3104_v10 = vor.u32 %v4015_v1, %v3101_v2 }
  0xd1   :  { %1783 = vmatpush.bf16.msrb.mxu1 %v2720_v21  ;;  %v3149_v21 = vld [vmem:[#allocation5 + $0x3d8] sm:$0xf0]  ;;  %v3360_v12 = vor.u32 %v4079_v6, %v3357_v7 }
  0xd2   :  { %1796 = vmatpush.bf16.msrb.mxu2 %v2848_v23  ;;  %v4059_v23 = vld [vmem:[#allocation5 + $0x4cc] sm:$0xf]  ;;  %v3152_v31 = vor.u32 %v4027_v17, %v3149_v21  ;;  %v3213_v21 = vld [vmem:[#allocation5 + $0x458] sm:$0xf0] }
  0xd3   :  { %1809 = vmatpush.bf16.msrb.mxu3 %v2976_v27  ;;  %v3405_v27 = vld [vmem:[#allocation5 + $0x5d8] sm:$0xf0] }
  0xd4   :  { %1771 = vmatpush.bf16.msrb.mxu0 %v3468_v33  ;;  %v3280_v33 = vor.u32 %v4059_v23, %v3277_v25  ;;  %v4075_v23 = vld [vmem:[#allocation5 + $0x54c] sm:$0xf] }
  0xd5   :  { %1784 = vmatpush.bf16.msrb.mxu1 %v2704_v35  ;;  %v3408_v35 = vor.u32 %v4091_v26, %v3405_v27  ;;  %v4107_v25 = vld [vmem:[#allocation5 + $0x64c] sm:$0xf]  ;;  %v3469_v26 = vld [vmem:[#allocation5 + $0x658] sm:$0xf0] }
  0xd6   :  { %1797 = vmatpush.bf16.msrb.mxu2 %v2832_v36  ;;  %v1543_v30 = vpop.f32.mrf.mxu2  ;;  %v4023_v36 = vld [vmem:[#allocation5 + $0x3ac] sm:$0xf] }
  0xd7   :  { %1810 = vmatpush.bf16.msrb.mxu3 %v2960_v44  ;;  %v1556_v32 = vpop.f32.mrf.mxu3  ;;  %v3261_v44 = vld [vmem:[#allocation5 + $0x4b8] sm:$0xf0]  ;;  %v3136_v49 = vor.u32 %v4023_v36, %v3133_v38  ;;  %v4039_v38 = vld [vmem:[#allocation5 + $0x42c] sm:$0xf] }
  0xd8   :  { %1772 = vmatpush.bf16.msrb.mxu0 %v3452_v50  ;;  %v3264_v50 = vor.u32 %v4055_v39, %v3261_v44  ;;  %v3069_v36 = vld [vmem:[#allocation5 + $0x338] sm:$0xf0]  ;;  %v3472_v39 = vor.u32 %v4107_v25, %v3469_v26  ;;  %v4071_v44 = vld [vmem:[#allocation5 + $0x52c] sm:$0xf] }
  0xd9   :  { %1785 = vmatpush.bf16.msrb.mxu1 %v2688_v53  ;;  %v3117_v53 = vld [vmem:[#allocation5 + $0x398] sm:$0xf0] }
  0xda   :  { %1798 = vmatpush.bf16.msrb.mxu2 %v2816_v54  ;;  %v4051_v54 = vld [vmem:[#allocation5 + $0x48c] sm:$0xf]  ;;  %v4157_v25 = vld [vmem:[#allocation8 + $0xd4] sm:$0xf0] }
  0xdb   :  { %1811 = vmatpush.bf16.msrb.mxu3 %v2944_v59  ;;  %v4115_v59 = vld [vmem:[#allocation5 + $0x68c] sm:$0xf] }
  0xdc   :  { %1773 = vmatpush.bf16.msrb.mxu0 %v3436_v3  ;;  %v4542_v61 = vpop.f32.mrf.mxu0  ;;  %v4047_v3 = vld [vmem:[#allocation5 + $0x46c] sm:$0xf]  ;;  %v3504_v4 = vor.u32 %v4115_v59, %v3501_v60  ;;  %v3309_v59 = vld [vmem:[#allocation5 + $0x518] sm:$0xf0] }
  0xdd   :  { %1786 = vmatpush.bf16.msrb.mxu1 %v2672_v8  ;;  %v4544_v62 = vpop.f32.mrf.mxu1  ;;  %v4111_v8 = vld [vmem:[#allocation5 + $0x66c] sm:$0xf]  ;;  %v3232_v11 = vor.u32 %v4047_v3, %v3229_v5  ;;  %v3675_v3 = vld [vmem:[#allocation8 + $0xf0] sm:$0xf] }
  0xde   :  { %1799 = vmatpush.bf16.msrb.mxu2 %v2800_v9  ;;  %v3485_v9 = vld [vmem:[#allocation5 + $0x678] sm:$0xf0]  ;;  %v4099_v60 = vld [vmem:[#allocation5 + $0x60c] sm:$0xf] }
  0xdf   :  { %1812 = vmatpush.bf16.msrb.mxu3 %v2928_v13  ;;  %1774 = vmatmul.bf16.vlgmr.msrb.gmra.mxu0 %v4508_v37  ;;  %v4011_v13 = vld [vmem:[#allocation5 + $0x34c] sm:$0xf]  ;;  %v3488_v17 = vor.u32 %v4111_v8, %v3485_v9  ;;  %v1516_v9 = vadd.f32 %v4530_v34, %v353_v48  ;;  %v3659_v34 = vld [vmem:[#allocation8 + $0xd0] sm:$0xf] }
  0xe0   :  { %1818 = vmatpush.bf16.msra.mxu0 %v3168_v14  ;;  %1787 = vmatmul.bf16.vlgmr.msrb.gmra.mxu1 %v4498_v19  ;;  %v3248_v19 = vor.u32 %v4051_v54, %v3245_v56  ;;  %v3085_v14 = vld [vmem:[#allocation5 + $0x358] sm:$0xf0]  ;;  %v4035_v54 = vld [vmem:[#allocation5 + $0x40c] sm:$0xf] }
  0xe1   :  { %1831 = vmatpush.bf16.msra.mxu1 %v3296_v15  ;;  %1800 = vmatmul.bf16.vlgmr.msrb.gmra.mxu2 %v4502_v22  ;;  %v3373_v22 = vld [vmem:[#allocation5 + $0x598] sm:$0xf0]  ;;  %v4043_v15 = vld [vmem:[#allocation5 + $0x44c] sm:$0xf]  ;;  %v3088_v29 = vor.u32 %v4011_v13, %v3085_v14  ;;  %v3667_v13 = vld [vmem:[#allocation8 + $0xe0] sm:$0xf] }
  0xe2   :  { %1844 = vmatpush.bf16.msra.mxu2 %v3424_v16  ;;  %1813 = vmatmul.bf16.vlgmr.msrb.gmra.mxu3 %v4496_v18  ;;  %v3120_v18 = vor.u32 %v4019_v52, %v3117_v53  ;;  %v3376_v0 = vor.u32 %v4083_v57, %v3373_v22  ;;  %v3216_v32 = vor.u32 %v4043_v15, %v3213_v21  ;;  %v3053_v53 = vld [vmem:[#allocation5 + $0x318] sm:$0xf0]  ;;  %v4067_v22 = vld [vmem:[#allocation5 + $0x50c] sm:$0xf]  ;;  %v3595_v21 = vld [vmem:[#allocation8 + $0x50] sm:$0xf] }
  0xe3   :  { %1857 = vmatpush.bf16.msra.mxu3 %v3552_v24  ;;  %v3341_v24 = vld [vmem:[#allocation5 + $0x558] sm:$0xf0]  ;;  %v3328_v52 = vor.u32 %v4071_v44, %v3325_v45  ;;  %v3456_v57 = vor.u32 %v4103_v46, %v3453_v47  ;;  %v3312_v6 = vor.u32 %v4067_v22, %v3309_v59  ;;  %v4159_v14 = vld [vmem:[#allocation8 + $0xe4] sm:$0xf0]  ;;  %v3571_v45 = vld [vmem:[#allocation8 + $0x20] sm:$0xf] }
  0xe4   :  { %1819 = vmatpush.bf16.msra.mxu0 %v3152_v31  ;;  %v4546_v16 = vpop.f32.mrf.mxu2  ;;  %v1569_v30 = vpop.f32.mrf.mxu0  ;;  %v4135_v46 = vld [vmem:[#allocation8 + $0x24] sm:$0xf0]  ;;  %v3627_v22 = vld [vmem:[#allocation8 + $0x90] sm:$0xf]  ;;  %v4149_v59 = vld [vmem:[#allocation8 + $0x94] sm:$0xf0] }
  0xe5   :  { %1832 = vmatpush.bf16.msra.mxu1 %v3280_v33  ;;  %v4548_v27 = vpop.f32.mrf.mxu3  ;;  %v1582_v31 = vpop.f32.mrf.mxu1  ;;  %v3344_v33 = vor.u32 %v4075_v23, %v3341_v24  ;;  %v4141_v23 = vld [vmem:[#allocation8 + $0x54] sm:$0xf0]  ;;  %v3668_v24 = vor.u32 %v4159_v14, %v3667_v13  ;;  %v4139_v30 = vld [vmem:[#allocation8 + $0x44] sm:$0xf0]  ;;  %v3605_v14 = vld [vmem:[#allocation8 + $0x68] sm:$0xf0] }
  0xe6   :  { %1845 = vmatpush.bf16.msra.mxu2 %v3408_v35  ;;  %v4007_v35 = vld [vmem:[#allocation5 + $0x32c] sm:$0xf]  ;;  %v3596_v26 = vor.u32 %v4141_v23, %v3595_v21  ;;  %v3651_v31 = vld [vmem:[#allocation8 + $0xc0] sm:$0xf]  ;;  %v3669_v21 = vld [vmem:[#allocation8 + $0xe8] sm:$0xf0] }
  0xe7   :  { %1858 = vmatpush.bf16.msra.mxu3 %v3536_v42  ;;  %v3197_v42 = vld [vmem:[#allocation5 + $0x438] sm:$0xf0]  ;;  %v3739_v23 = vld [vmem:[#allocation8 + $0x170] sm:$0xf] }
  0xe8   :  { %1820 = vmatpush.bf16.msra.mxu0 %v3136_v49  ;;  %v3072_v49 = vor.u32 %v4007_v35, %v3069_v36  ;;  %v4137_v36 = vld [vmem:[#allocation8 + $0x34] sm:$0xf0] }
  0xe9   :  { %1833 = vmatpush.bf16.msra.mxu1 %v3264_v50  ;;  %v4003_v50 = vld [vmem:[#allocation5 + $0x30c] sm:$0xf] }
  0xea   :  { %1846 = vmatpush.bf16.msra.mxu2 %v3392_v51  ;;  %v3200_v51 = vor.u32 %v4039_v38, %v3197_v42  ;;  %v3056_v2 = vor.u32 %v4003_v50, %v3053_v53  ;;  %v4153_v42 = vld [vmem:[#allocation8 + $0xb4] sm:$0xf0]  ;;  %v4151_v50 = vld [vmem:[#allocation8 + $0xa4] sm:$0xf0] }
  0xeb   :  { %1859 = vmatpush.bf16.msra.mxu3 %v3520_v55  ;;  %v3181_v55 = vld [vmem:[#allocation5 + $0x418] sm:$0xf0] }
  0xec   :  { %1821 = vmatpush.bf16.msra.mxu0 %v3120_v18  ;;  %v1595_v56 = vpop.f32.mrf.mxu2  ;;  %v3437_v18 = vld [vmem:[#allocation5 + $0x618] sm:$0xf0]  ;;  %v3184_v5 = vor.u32 %v4035_v54, %v3181_v55  ;;  %v3563_v55 = vld [vmem:[#allocation8 + $0x10] sm:$0xf] }
  0xed   :  { %1834 = vmatpush.bf16.msra.mxu1 %v3248_v19  ;;  %v3611_v19 = vld [vmem:[#allocation8 + $0x70] sm:$0xf]  ;;  %v1608_v1 = vpop.f32.mrf.mxu3  ;;  %v3440_v7 = vor.u32 %v4099_v60, %v3437_v18 }
  0xee   :  { %1847 = vmatpush.bf16.msra.mxu2 %v3376_v0  ;;  %v4145_v0 = vld [vmem:[#allocation8 + $0x74] sm:$0xf0]  ;;  %v4131_v1 = vld [vmem:[#allocation8 + $0x4] sm:$0xf0] }
  0xef   :  { %1860 = vmatpush.bf16.msra.mxu3 %v3504_v4  ;;  %v4161_v4 = vld [vmem:[#allocation8 + $0xf4] sm:$0xf0]  ;;  %v3612_v8 = vor.u32 %v4145_v0, %v3611_v19  ;;  %v3555_v0 = vld [vmem:[#allocation8] sm:$0xf] }
  0xf0   :  { %1822 = vmatpush.bf16.msra.mxu0 %v3104_v10  ;;  %v3603_v10 = vld [vmem:[#allocation8 + $0x60] sm:$0xf] }
  0xf1   :  { %1835 = vmatpush.bf16.msra.mxu1 %v3232_v11  ;;  %v4143_v11 = vld [vmem:[#allocation8 + $0x64] sm:$0xf0] }
  0xf2   :  { %1848 = vmatpush.bf16.msra.mxu2 %v3360_v12  ;;  %v3676_v12 = vor.u32 %v4161_v4, %v3675_v3  ;;  %v3604_v15 = vor.u32 %v4143_v11, %v3603_v10  ;;  %v4144_v3 = vld [vmem:[#allocation8 + $0x74] sm:$0xf]  ;;  %v3556_v11 = vor.u32 %v4131_v1, %v3555_v0  ;;  %v3573_v1 = vld [vmem:[#allocation8 + $0x28] sm:$0xf0] }
  0xf3   :  { %1861 = vmatpush.bf16.msra.mxu3 %v3488_v17  ;;  %v1529_v17 = vadd.f32 %v4532_v43, %v1516_v9  ;;  %v3587_v43 = vld [vmem:[#allocation8 + $0x40] sm:$0xf]  ;;  %v3677_v9 = vld [vmem:[#allocation8 + $0xf8] sm:$0xf0] }
  0xf4   :  { %1823 = vmatpush.bf16.msra.mxu0 %v3088_v29 }
  0xf5   :  { %1836 = vmatpush.bf16.msra.mxu1 %v3216_v32  ;;  %v1542_v29 = vadd.f32 %v4534_v58, %v1529_v17  ;;  %v4155_v32 = vld [vmem:[#allocation8 + $0xc4] sm:$0xf0]  ;;  %v4158_v17 = vld [vmem:[#allocation8 + $0xe4] sm:$0xf] }
  0xf6   :  { %1849 = vmatpush.bf16.msra.mxu2 %v3344_v33  ;;  %v3588_v33 = vor.u32 %v4139_v30, %v3587_v43  ;;  %v3652_v38 = vor.u32 %v4155_v32, %v3651_v31  ;;  %v3731_v43 = vld [vmem:[#allocation8 + $0x160] sm:$0xf]  ;;  %v4175_v30 = vld [vmem:[#allocation8 + $0x164] sm:$0xf0]  ;;  %v3597_v31 = vld [vmem:[#allocation8 + $0x58] sm:$0xf0]  ;;  %v3672_v32 = vor.u32 %v4158_v17, %v3669_v21 }
  0xf7   :  { %1862 = vmatpush.bf16.msra.mxu3 %v3472_v39  ;;  %v3643_v39 = vld [vmem:[#allocation8 + $0xb0] sm:$0xf]  ;;  %v4165_v17 = vld [vmem:[#allocation8 + $0x114] sm:$0xf0]  ;;  %v4148_v21 = vld [vmem:[#allocation8 + $0x94] sm:$0xf] }
  0xf8   :  { %1824 = vmatpush.bf16.msra.mxu0 %v3072_v49  ;;  %v3644_v47 = vor.u32 %v4153_v42, %v3643_v39  ;;  %v4138_v39 = vld [vmem:[#allocation8 + $0x44] sm:$0xf]  ;;  %v3589_v42 = vld [vmem:[#allocation8 + $0x48] sm:$0xf0] }
  0xf9   :  { %1837 = vmatpush.bf16.msra.mxu1 %v3200_v51  ;;  %v354_v51 = vperm.slane %v4550_v28, 1 }
  0xfa   :  { %1850 = vmatpush.bf16.msra.mxu2 %v3328_v52  ;;  %v3572_v52 = vor.u32 %v4135_v46, %v3571_v45  ;;  %v3653_v46 = vld [vmem:[#allocation8 + $0xc8] sm:$0xf0] }
  0xfb   :  { %1863 = vmatpush.bf16.msra.mxu3 %v3456_v57  ;;  %v1607_v60 = vadd.f32 %v4548_v27, %v354_v51 }
  0xfc   :  { %1825 = vmatpush.bf16.msra.mxu0 %v3056_v2  ;;  %v1619_v35 = vpop.f32.mrf.mxu0  ;;  %v3628_v2 = vor.u32 %v4149_v59, %v3627_v22  ;;  %v4169_v22 = vld [vmem:[#allocation8 + $0x134] sm:$0xf0] }
  0xfd   :  { %1838 = vmatpush.bf16.msra.mxu1 %v3184_v5  ;;  %v3619_v5 = vld [vmem:[#allocation8 + $0x80] sm:$0xf]  ;;  %v1620_v10 = vadd.f32 %v1619_v35, %v1607_v60  ;;  %v3732_v35 = vor.u32 %v4175_v30, %v3731_v43  ;;  %v4152_v60 = vld [vmem:[#allocation8 + $0xb4] sm:$0xf]  ;;  %v4146_v30 = vld [vmem:[#allocation8 + $0x84] sm:$0xf] }
  0xfe   :  { %1851 = vmatpush.bf16.msra.mxu2 %v3312_v6  ;;  %v4147_v6 = vld [vmem:[#allocation8 + $0x84] sm:$0xf0] }
  0xff   :  { %1864 = vmatpush.bf16.msra.mxu3 %v3440_v7  ;;  %1826 = vmatmul.bf16.vlgmr.msra.gmra.mxu0 %v4500_v20  ;;  %v3660_v20 = vor.u32 %v4157_v25, %v3659_v34  ;;  %v3620_v13 = vor.u32 %v4147_v6, %v3619_v5  ;;  %v4150_v6 = vld [vmem:[#allocation8 + $0xa4] sm:$0xf] }
 0x100   :  { %2268 = vmatpush.bf16.msrb.mxu0 %v3612_v8  ;;  %1839 = vmatmul.bf16.vlgmr.msra.gmra.mxu1 %v4510_v40  ;;  %v1555_v40 = vadd.f32 %v4536_v63, %v1542_v29  ;;  %v3635_v63 = vld [vmem:[#allocation8 + $0xa0] sm:$0xf]  ;;  %v4160_v8 = vld [vmem:[#allocation8 + $0xf4] sm:$0xf] }
 0x101   :  { %2281 = vmatpush.bf16.msrb.mxu1 %v3676_v12  ;;  %1852 = vmatmul.bf16.vlgmr.msra.gmra.mxu2 %v4512_v41  ;;  %v3579_v41 = vld [vmem:[#allocation8 + $0x30] sm:$0xf]  ;;  %v3636_v56 = vor.u32 %v4151_v50, %v3635_v63  ;;  %v4171_v63 = vld [vmem:[#allocation8 + $0x144] sm:$0xf0] }
 0x102   :  { %1865 = vmatmul.bf16.vlgmr.msra.gmra.mxu3 %v4508_v37  ;;  %v1632_v37 = vpop.f32.mrf.mxu1  ;;  %v3580_v58 = vor.u32 %v4137_v36, %v3579_v41  ;;  %v1568_v44 = vadd.f32 %v4542_v61, %v1555_v40  ;;  %v4133_v61 = vld [vmem:[#allocation8 + $0x14] sm:$0xf0]  ;;  %v3661_v40 = vld [vmem:[#allocation8 + $0xd8] sm:$0xf0]  ;;  %v3723_v41 = vld [vmem:[#allocation8 + $0x150] sm:$0xf] }
 0x103   :  { %v3564_v18 = vor.u32 %v4133_v61, %v3563_v55  ;;  %v1633_v34 = vadd.f32 %v1632_v37, %v1620_v10  ;;  %v4173_v36 = vld [vmem:[#allocation8 + $0x154] sm:$0xf0]  ;;  %v3581_v55 = vld [vmem:[#allocation8 + $0x38] sm:$0xf0] }
 0x104   :  { %2269 = vmatpush.bf16.msrb.mxu0 %v3604_v15  ;;  %v4562_v48 = vpop.f32.mrf.mxu2  ;;  %v1621_v53 = vpop.f32.mrf.mxu0  ;;  %v1581_v54 = vadd.f32 %v4544_v62, %v1568_v44  ;;  %v3613_v62 = vld [vmem:[#allocation8 + $0x78] sm:$0xf0]  ;;  %v3680_v15 = vor.u32 %v4160_v8, %v3677_v9  ;;  %v4154_v44 = vld [vmem:[#allocation8 + $0xc4] sm:$0xf]  ;;  %v3724_v45 = vor.u32 %v4173_v36, %v3723_v41 }
 0x105   :  { %2282 = vmatpush.bf16.msrb.mxu1 %v3668_v24  ;;  %v4564_v49 = vpop.f32.mrf.mxu3  ;;  %v3616_v12 = vor.u32 %v4144_v3, %v3613_v62  ;;  %v4177_v24 = vld [vmem:[#allocation8 + $0x174] sm:$0xf0]  ;;  %v3656_v61 = vor.u32 %v4154_v44, %v3653_v46  ;;  %v4167_v62 = vld [vmem:[#allocation8 + $0x124] sm:$0xf0] }
 0x106   :  { %v1594_v19 = vadd.f32 %v4546_v16, %v1581_v54  ;;  %v4142_v16 = vld [vmem:[#allocation8 + $0x64] sm:$0xf]  ;;  %v3740_v25 = vor.u32 %v4177_v24, %v3739_v23  ;;  %v3629_v23 = vld [vmem:[#allocation8 + $0x98] sm:$0xf0]  ;;  %v4193_v46 = vld [vmem:[#allocation8 + $0x1f4] sm:$0xf0] }
 0x107   :  { %v3608_v29 = vor.u32 %v4142_v16, %v3605_v14  ;;  %v3632_v43 = vor.u32 %v4148_v21, %v3629_v23  ;;  %v3763_v21 = vld [vmem:[#allocation8 + $0x1a0] sm:$0xf]  ;;  %v4183_v23 = vld [vmem:[#allocation8 + $0x1a4] sm:$0xf0] }
 0x108   :  { %2270 = vmatpush.bf16.msrb.mxu0 %v3596_v26  ;;  %v1870_v27 = vmax.f32 %v1594_v19, 0.0  ;;  %2294 = vmatpush.bf16.msrb.mxu2 %v3740_v25  ;;  %v3557_v25 = vld [vmem:[#allocation8 + $0x8] sm:$0xf0] }
 0x109   :  { %2283 = vmatpush.bf16.msrb.mxu1 %v3660_v20  ;;  %v4140_v20 = vld [vmem:[#allocation8 + $0x54] sm:$0xf] }
 0x10a   :  { %v1634_v57 = vpop.f32.mrf.mxu1  ;;  %v4570_v26 = vpack.c.bf16 %v1870_v27, %v1870_v27  ;;  %v3600_v37 = vor.u32 %v4140_v20, %v3597_v31  ;;  %v4132_v27 = vld [vmem:[#allocation8 + $0x14] sm:$0xf]  ;;  %v3683_v20 = vld [vmem:[#allocation8 + $0x100] sm:$0xf]  ;;  %v4163_v31 = vld [vmem:[#allocation8 + $0x104] sm:$0xf0] }
 0x10b   :  { %v3707_v57 = vld [vmem:[#allocation8 + $0x130] sm:$0xf] }
 0x10c   :  { %2271 = vmatpush.bf16.msrb.mxu0 %v3588_v33  ;;  %v1647_v4 = vpop.f32.mrf.mxu2  ;;  %v4156_v33 = vld [vmem:[#allocation8 + $0xd4] sm:$0xf]  ;;  %2295 = vmatpush.bf16.msrb.mxu2 %v3732_v35 }
 0x10d   :  { %2284 = vmatpush.bf16.msrb.mxu1 %v3652_v38  ;;  %v1660_v7 = vpop.f32.mrf.mxu3  ;;  %v1646_v38 = vadd.f32 %v4562_v48, %v1633_v34  ;;  %v4136_v48 = vld [vmem:[#allocation8 + $0x34] sm:$0xf]  ;;  %v3699_v4 = vld [vmem:[#allocation8 + $0x120] sm:$0xf]  ;;  %v4130_v34 = vld [vmem:[#allocation8 + $0x4] sm:$0xf] }
 0x10e   :  { %v3584_v19 = vor.u32 %v4136_v48, %v3581_v55  ;;  %v3637_v7 = vld [vmem:[#allocation8 + $0xa8] sm:$0xf0]  ;;  %v3700_v16 = vor.u32 %v4167_v62, %v3699_v4  ;;  %v4176_v35 = vld [vmem:[#allocation8 + $0x174] sm:$0xf]  ;;  %v3560_v41 = vor.u32 %v4130_v34, %v3557_v25  ;;  %v4170_v48 = vld [vmem:[#allocation8 + $0x144] sm:$0xf] }
 0x10f   :  { %v1659_v50 = vadd.f32 %v4564_v49, %v1646_v38  ;;  %v4134_v49 = vld [vmem:[#allocation8 + $0x24] sm:$0xf]  ;;  %v3640_v14 = vor.u32 %v4150_v6, %v3637_v7  ;;  %v3684_v38 = vor.u32 %v4163_v31, %v3683_v20  ;;  %v3701_v62 = vld [vmem:[#allocation8 + $0x128] sm:$0xf0]  ;;  %v3755_v31 = vld [vmem:[#allocation8 + $0x190] sm:$0xf] }
 0x110   :  { %2272 = vmatpush.bf16.msrb.mxu0 %v3580_v58  ;;  %v3664_v58 = vor.u32 %v4156_v33, %v3661_v40  ;;  %2296 = vmatpush.bf16.msrb.mxu2 %v3724_v45  ;;  %v3576_v9 = vor.u32 %v4134_v49, %v3573_v1  ;;  %v3741_v40 = vld [vmem:[#allocation8 + $0x178] sm:$0xf0]  ;;  %v3803_v45 = vld [vmem:[#allocation8 + $0x1f0] sm:$0xf]  ;;  %v3779_v49 = vld [vmem:[#allocation8 + $0x1c0] sm:$0xf] }
 0x111   :  { %2285 = vmatpush.bf16.msrb.mxu1 %v3644_v47  ;;  %v3715_v47 = vld [vmem:[#allocation8 + $0x140] sm:$0xf]  ;;  %v4166_v4 = vld [vmem:[#allocation8 + $0x124] sm:$0xf]  ;;  %v3685_v25 = vld [vmem:[#allocation8 + $0x108] sm:$0xf0] }
 0x112   :  { %v4162_v34 = vld [vmem:[#allocation8 + $0x104] sm:$0xf] }
 0x114   :  { %2273 = vmatpush.bf16.msrb.mxu0 %v3572_v52  ;;  %v3592_v52 = vor.u32 %v4138_v39, %v3589_v42  ;;  %v3744_v39 = vor.u32 %v4176_v35, %v3741_v40  ;;  %v4174_v42 = vld [vmem:[#allocation8 + $0x164] sm:$0xf]  ;;  %v4179_v35 = vld [vmem:[#allocation8 + $0x184] sm:$0xf0] }
 0x115   :  { %2286 = vmatpush.bf16.msrb.mxu1 %v3636_v56  ;;  %v3716_v56 = vor.u32 %v4171_v63, %v3715_v47  ;;  %v4172_v47 = vld [vmem:[#allocation8 + $0x154] sm:$0xf]  ;;  %v3804_v63 = vor.u32 %v4193_v46, %v3803_v45 }
 0x117   :  { %2297 = vmatpush.bf16.msrb.mxu2 %v3716_v56  ;;  %2307 = vmatpush.bf16.msrb.mxu3 %v3804_v63  ;;  %v3717_v56 = vld [vmem:[#allocation8 + $0x148] sm:$0xf0] }
 0x118   :  { %2274 = vmatpush.bf16.msrb.mxu0 %v3564_v18  ;;  %v3645_v18 = vld [vmem:[#allocation8 + $0xb8] sm:$0xf0] }
 0x119   :  { %2287 = vmatpush.bf16.msrb.mxu1 %v3628_v2  ;;  %v3708_v2 = vor.u32 %v4169_v22, %v3707_v57  ;;  %v3648_v3 = vor.u32 %v4152_v60, %v3645_v18  ;;  %v3720_v57 = vor.u32 %v4170_v48, %v3717_v56  ;;  %v3787_v22 = vld [vmem:[#allocation8 + $0x1d0] sm:$0xf]  ;;  %v4168_v60 = vld [vmem:[#allocation8 + $0x134] sm:$0xf]  ;;  %v3781_v56 = vld [vmem:[#allocation8 + $0x1c8] sm:$0xf0] }
 0x11b   :  { %2298 = vmatpush.bf16.msrb.mxu2 %v3708_v2 }
 0x11c   :  { %2275 = vmatpush.bf16.msrb.mxu0 %v3556_v11  ;;  %v1671_v51 = vpop.f32.mrf.mxu0 }
 0x11d   :  { %2288 = vmatpush.bf16.msrb.mxu1 %v3620_v13  ;;  %v1672_v53 = vadd.f32 %v1671_v51, %v1659_v50  ;;  %v1684_v54 = vpop.f32.mrf.mxu1  ;;  %v3725_v50 = vld [vmem:[#allocation8 + $0x158] sm:$0xf0] }
 0x11e   :  { %v3728_v51 = vor.u32 %v4172_v47, %v3725_v50  ;;  %v4188_v50 = vld [vmem:[#allocation8 + $0x1d4] sm:$0xf] }
 0x11f   :  { %2276 = vmatmul.bf16.vlgmr.msrb.gmra.mxu0 %v4570_v26  ;;  %v1685_v59 = vadd.f32 %v1684_v54, %v1672_v53  ;;  %2299 = vmatpush.bf16.msrb.mxu2 %v3700_v16  ;;  %v3795_v53 = vld [vmem:[#allocation8 + $0x1e0] sm:$0xf]  ;;  %v4191_v54 = vld [vmem:[#allocation8 + $0x1e4] sm:$0xf0]  ;;  %v3693_v16 = vld [vmem:[#allocation8 + $0x118] sm:$0xf0] }
 0x120   :  { %2320 = vmatpush.bf16.msra.mxu0 %v3616_v12  ;;  %v3565_v12 = vld [vmem:[#allocation8 + $0x18] sm:$0xf0] }
 0x121   :  { %2333 = vmatpush.bf16.msra.mxu1 %v3680_v15  ;;  %v1871_v0 = vmax.f32 %v1685_v59, 0.0  ;;  %v3691_v15 = vld [vmem:[#allocation8 + $0x110] sm:$0xf]  ;;  %v3568_v24 = vor.u32 %v4132_v27, %v3565_v12  ;;  %v4189_v59 = vld [vmem:[#allocation8 + $0x1d4] sm:$0xf0] }
 0x122   :  { %v4185_v27 = vld [vmem:[#allocation8 + $0x1b4] sm:$0xf0] }
 0x123   :  { %v1875_v5 = vpack.c.bf16 %v1871_v0, %v1871_v0  ;;  %v3709_v0 = vld [vmem:[#allocation8 + $0x138] sm:$0xf0] }
 0x124   :  { %2321 = vmatpush.bf16.msra.mxu0 %v3608_v29  ;;  %v4575_v8 = vpop.f32.mrf.mxu2  ;;  %v1673_v11 = vpop.f32.mrf.mxu0  ;;  %v3692_v29 = vor.u32 %v4165_v17, %v3691_v15  ;;  %v3712_v2 = vor.u32 %v4168_v60, %v3709_v0 }
 0x125   :  { %2334 = vmatpush.bf16.msra.mxu1 %v3672_v32  ;;  %v4577_v10 = vpop.f32.mrf.mxu3  ;;  %v1686_v13 = vpop.f32.mrf.mxu1  ;;  %v3621_v32 = vld [vmem:[#allocation8 + $0x88] sm:$0xf0]  ;;  %v3771_v11 = vld [vmem:[#allocation8 + $0x1b0] sm:$0xf] }
 0x126   :  { %2289 = vmatmul.bf16.vlgmr.msrb.gmra.mxu1 %v1875_v5  ;;  %2300 = vmatpush.bf16.msrb.mxu2 %v3692_v29  ;;  %v4164_v13 = vld [vmem:[#allocation8 + $0x114] sm:$0xf]  ;;  %v3764_v29 = vor.u32 %v4183_v23, %v3763_v21 }
 0x127   :  { %v3696_v17 = vor.u32 %v4164_v13, %v3693_v16 }
 0x128   :  { %2322 = vmatpush.bf16.msra.mxu0 %v3600_v37  ;;  %v3624_v37 = vor.u32 %v4146_v30, %v3621_v32  ;;  %v3688_v30 = vor.u32 %v4162_v34, %v3685_v25  ;;  %v4181_v32 = vld [vmem:[#allocation8 + $0x194] sm:$0xf0] }
 0x129   :  { %2335 = vmatpush.bf16.msra.mxu1 %v3664_v58  ;;  %v3733_v58 = vld [vmem:[#allocation8 + $0x168] sm:$0xf0] }
 0x12a   :  { %2301 = vmatpush.bf16.msrb.mxu2 %v3684_v38  ;;  %v3736_v44 = vor.u32 %v4174_v42, %v3733_v58  ;;  %v3805_v38 = vld [vmem:[#allocation8 + $0x1f8] sm:$0xf0]  ;;  %v4190_v58 = vld [vmem:[#allocation8 + $0x1e4] sm:$0xf] }
 0x12c   :  { %2323 = vmatpush.bf16.msra.mxu0 %v3592_v52  ;;  %v1699_v33 = vpop.f32.mrf.mxu2 }
 0x12d   :  { %2336 = vmatpush.bf16.msra.mxu1 %v3656_v61  ;;  %v1712_v36 = vpop.f32.mrf.mxu3  ;;  %v3796_v61 = vor.u32 %v4191_v54, %v3795_v53  ;;  %v3747_v33 = vld [vmem:[#allocation8 + $0x180] sm:$0xf] }
 0x12e   :  { %2346 = vmatpush.bf16.msra.mxu2 %v3744_v39  ;;  %v3748_v40 = vor.u32 %v4179_v35, %v3747_v33  ;;  %v4192_v36 = vld [vmem:[#allocation8 + $0x1f4] sm:$0xf] }
 0x12f   :  { %2308 = vmatpush.bf16.msrb.mxu3 %v3796_v61  ;;  %v4186_v61 = vld [vmem:[#allocation8 + $0x1c4] sm:$0xf] }
 0x130   :  { %2324 = vmatpush.bf16.msra.mxu0 %v3584_v19  ;;  %v3788_v19 = vor.u32 %v4189_v59, %v3787_v22  ;;  %v4184_v22 = vld [vmem:[#allocation8 + $0x1b4] sm:$0xf]  ;;  %v3773_v59 = vld [vmem:[#allocation8 + $0x1b8] sm:$0xf0] }
 0x131   :  { %2337 = vmatpush.bf16.msra.mxu1 %v3648_v3  ;;  %v4187_v3 = vld [vmem:[#allocation8 + $0x1c4] sm:$0xf0]  ;;  %v3776_v60 = vor.u32 %v4184_v22, %v3773_v59 }
 0x132   :  { %2347 = vmatpush.bf16.msra.mxu2 %v3736_v44  ;;  %v3797_v44 = vld [vmem:[#allocation8 + $0x1e8] sm:$0xf0] }
 0x133   :  { %2309 = vmatpush.bf16.msrb.mxu3 %v3788_v19  ;;  %v3800_v46 = vor.u32 %v4190_v58, %v3797_v44  ;;  %v3765_v19 = vld [vmem:[#allocation8 + $0x1a8] sm:$0xf0]  ;;  %v4201_v58 = vld [vmem:[#allocation10 + $0x38] sm:$0xff]  ;;  %v4200_v44 = vld [vmem:[#allocation10 + $0x30] sm:$0xff] }
 0x134   :  { %2325 = vmatpush.bf16.msra.mxu0 %v3576_v9  ;;  %v3704_v9 = vor.u32 %v4166_v4, %v3701_v62  ;;  %v356_v4 = vperm.slane %v4550_v28, 3  ;;  %v4203_v22 = vld [vmem:[#allocation10 + $0x48] sm:$0xff] }
 0x135   :  { %2338 = vmatpush.bf16.msra.mxu1 %v3640_v14  ;;  %v3772_v14 = vor.u32 %v4185_v27, %v3771_v11 }
 0x136   :  { %2348 = vmatpush.bf16.msra.mxu2 %v3728_v51  ;;  %v3789_v51 = vld [vmem:[#allocation8 + $0x1d8] sm:$0xf0] }
 0x137   :  { %v3792_v53 = vor.u32 %v4188_v50, %v3789_v51  ;;  %v4197_v50 = vld [vmem:[#allocation10 + $0x18] sm:$0xff]  ;;  %v4196_v51 = vld [vmem:[#allocation10 + $0x10] sm:$0xff] }
 0x138   :  { %2326 = vmatpush.bf16.msra.mxu0 %v3568_v24 }
 0x139   :  { %2339 = vmatpush.bf16.msra.mxu1 %v3632_v43 }
 0x13a   :  { %2349 = vmatpush.bf16.msra.mxu2 %v3720_v57  ;;  %v3784_v57 = vor.u32 %v4186_v61, %v3781_v56  ;;  %v4206_v61 = vld [vmem:[#allocation10 + $0x60] sm:$0xff]  ;;  %v4205_v56 = vld [vmem:[#allocation10 + $0x58] sm:$0xff] }
 0x13c   :  { %2327 = vmatpush.bf16.msra.mxu0 %v3560_v41  ;;  %v1723_v52 = vpop.f32.mrf.mxu0 }
 0x13d   :  { %2340 = vmatpush.bf16.msra.mxu1 %v3624_v37  ;;  %v1736_v55 = vpop.f32.mrf.mxu1  ;;  %v3808_v37 = vor.u32 %v4192_v36, %v3805_v38 }
 0x13e   :  { %2350 = vmatpush.bf16.msra.mxu2 %v3712_v2  ;;  %v4180_v2 = vld [vmem:[#allocation8 + $0x194] sm:$0xf] }
 0x13f   :  { %2328 = vmatmul.bf16.vlgmr.msra.gmra.mxu0 %v4570_v26  ;;  %v355_v26 = vperm.slane %v4550_v28, 2 }
 0x140   :  { %2341 = vmatmul.bf16.vlgmr.msra.gmra.mxu1 %v1875_v5  ;;  %v3780_v5 = vor.u32 %v4187_v3, %v3779_v49  ;;  %v3757_v3 = vld [vmem:[#allocation8 + $0x198] sm:$0xf0]  ;;  %2508 = vmatpush.bf16.msrb.mxu0 %v4201_v58 }
 0x141   :  { %v1698_v6 = vadd.f32 %v4575_v8, %v355_v26  ;;  %v3760_v62 = vor.u32 %v4180_v2, %v3757_v3 }
 0x142   :  { %2310 = vmatpush.bf16.msrb.mxu3 %v3780_v5  ;;  %2351 = vmatpush.bf16.msra.mxu2 %v3704_v9  ;;  %v4178_v5 = vld [vmem:[#allocation8 + $0x184] sm:$0xf] }
 0x143   :  { %v1711_v15 = vadd.f32 %v4577_v10, %v1698_v6  ;;  %v3756_v10 = vor.u32 %v4181_v32, %v3755_v31  ;;  %v3749_v6 = vld [vmem:[#allocation8 + $0x188] sm:$0xf0] }
 0x144   :  { %v1749_v18 = vpop.f32.mrf.mxu2  ;;  %v1725_v7 = vpop.f32.mrf.mxu0  ;;  %v3752_v9 = vor.u32 %v4178_v5, %v3749_v6  ;;  %2509 = vmatpush.bf16.msrb.mxu0 %v4200_v44 }
 0x145   :  { %v1762_v1 = vpop.f32.mrf.mxu3  ;;  %v1738_v12 = vpop.f32.mrf.mxu1  ;;  %v1724_v43 = vadd.f32 %v1723_v52, %v1711_v15 }
 0x146   :  { %2311 = vmatpush.bf16.msrb.mxu3 %v3772_v14  ;;  %2352 = vmatpush.bf16.msra.mxu2 %v3696_v17 }
 0x147   :  { %v1737_v20 = vadd.f32 %v1736_v55, %v1724_v43 }
 0x149   :  { %v1750_v41 = vadd.f32 %v1749_v18, %v1737_v20  ;;  %v4182_v18 = vld [vmem:[#allocation8 + $0x1a4] sm:$0xf] }
 0x14a   :  { %2312 = vmatpush.bf16.msrb.mxu3 %v3764_v29  ;;  %2353 = vmatpush.bf16.msra.mxu2 %v3688_v30  ;;  %v1942_v30 = vld [vmem:[%s4600_s4] sm:$0x3] }
 0x14b   :  { %v1763_v39 = vadd.f32 %v1762_v1, %v1750_v41  ;;  %v3768_v1 = vor.u32 %v4182_v18, %v3765_v19  ;;  %v1944_v31 = vperm.slane %v1942_v30, 0 }
 0x14c   :  { %v1751_v24 = vpop.f32.mrf.mxu2 }
 0x14d   :  { %v1764_v8 = vpop.f32.mrf.mxu3 }
 0x14e   :  { %2313 = vmatpush.bf16.msrb.mxu3 %v3756_v10 }
 0x152   :  { %2314 = vmatpush.bf16.msrb.mxu3 %v3748_v40  ;;  %v1945_v40 = vperm.slane %v1942_v30, 1 }
 0x156   :  { %2359 = vmatpush.bf16.msra.mxu3 %v3808_v37 }
 0x15a   :  { %2360 = vmatpush.bf16.msra.mxu3 %v3800_v46  ;;  %v4198_v46 = vld [vmem:[#allocation10 + $0x20] sm:$0xff] }
 0x15c   :  { %v1775_v42 = vpop.f32.mrf.mxu0 }
 0x15d   :  { %v1776_v45 = vadd.f32 %v1775_v42, %v1763_v39  ;;  %v1788_v47 = vpop.f32.mrf.mxu1 }
 0x15e   :  { %2361 = vmatpush.bf16.msra.mxu3 %v3792_v53  ;;  %v1789_v7 = vadd.f32 %v1788_v47, %v356_v4  ;;  %v4209_v47 = vld [vmem:[#allocation10 + $0x78] sm:$0xff]  ;;  %v4195_v53 = vld [vmem:[#allocation10 + $0x8] sm:$0xff] }
 0x15f   :  { %v1872_v63 = vmax.f32 %v1776_v45, 0.0  ;;  %v4199_v45 = vld [vmem:[#allocation10 + $0x28] sm:$0xff]  ;;  %2521 = vmatpush.bf16.msrb.mxu1 %v4209_v47 }
 0x160   :  { %2510 = vmatpush.bf16.msrb.mxu0 %v4199_v45 }
 0x161   :  { %v1876_v52 = vpack.c.bf16 %v1872_v63, %v1872_v63  ;;  %v4208_v63 = vld [vmem:[#allocation10 + $0x70] sm:$0xff] }
 0x162   :  { %2362 = vmatpush.bf16.msra.mxu3 %v3784_v57  ;;  %v4204_v57 = vld [vmem:[#allocation10 + $0x50] sm:$0xff] }
 0x163   :  { %2302 = vmatmul.bf16.vlgmr.msrb.gmra.mxu2 %v1876_v52  ;;  %2522 = vmatpush.bf16.msrb.mxu1 %v4208_v63 }
 0x164   :  { %v1801_v54 = vpop.f32.mrf.mxu2  ;;  %v1777_v55 = vpop.f32.mrf.mxu0  ;;  %2511 = vmatpush.bf16.msrb.mxu0 %v4198_v46 }
 0x165   :  { %v1814_v48 = vpop.f32.mrf.mxu3  ;;  %v1790_v26 = vpop.f32.mrf.mxu1  ;;  %v1802_v11 = vadd.f32 %v1801_v54, %v1789_v7  ;;  %v4207_v54 = vld [vmem:[#allocation10 + $0x68] sm:$0xff]  ;;  %v4194_v55 = vld [vmem:[#allocation10] sm:$0xff] }
 0x166   :  { %2363 = vmatpush.bf16.msra.mxu3 %v3776_v60  ;;  %v4202_v60 = vld [vmem:[#allocation10 + $0x40] sm:$0xff] }
 0x167   :  { %v1815_v27 = vadd.f32 %v1814_v48, %v1802_v11  ;;  %2523 = vmatpush.bf16.msrb.mxu1 %v4207_v54  ;;  %v4216_v11 = vld [vmem:[#allocation11 + $0x30] sm:$0xff] }
 0x168   :  { %2512 = vmatpush.bf16.msrb.mxu0 %v4197_v50 }
 0x16a   :  { %2364 = vmatpush.bf16.msra.mxu3 %v3768_v1 }
 0x16b   :  { %2524 = vmatpush.bf16.msrb.mxu1 %v4206_v61 }
 0x16c   :  { %v1803_v0 = vpop.f32.mrf.mxu2  ;;  %2513 = vmatpush.bf16.msrb.mxu0 %v4196_v51 }
 0x16d   :  { %v1816_v49 = vpop.f32.mrf.mxu3 }
 0x16e   :  { %2365 = vmatpush.bf16.msra.mxu3 %v3760_v62 }
 0x16f   :  { %2525 = vmatpush.bf16.msrb.mxu1 %v4205_v56 }
 0x170   :  { %2514 = vmatpush.bf16.msrb.mxu0 %v4195_v53 }
 0x172   :  { %2366 = vmatpush.bf16.msra.mxu3 %v3752_v9  ;;  %v4217_v9 = vld [vmem:[#allocation11 + $0x38] sm:$0xff] }
 0x173   :  { %2354 = vmatmul.bf16.vlgmr.msra.gmra.mxu2 %v1876_v52  ;;  %2526 = vmatpush.bf16.msrb.mxu1 %v4204_v57 }
 0x174   :  { %2515 = vmatpush.bf16.msrb.mxu0 %v4194_v55  ;;  %2622 = vmatpush.bf16.msrb.mxu2 %v4217_v9 }
 0x177   :  { %2527 = vmatpush.bf16.msrb.mxu1 %v4203_v22 }
 0x178   :  { %2623 = vmatpush.bf16.msrb.mxu2 %v4216_v11 }
 0x17b   :  { %2528 = vmatpush.bf16.msrb.mxu1 %v4202_v60 }
 0x17c   :  { %v1827_v12 = vpop.f32.mrf.mxu0 }
 0x17d   :  { %v1840_v13 = vpop.f32.mrf.mxu1  ;;  %v1828_v16 = vadd.f32 %v1827_v12, %v1815_v27  ;;  %v4215_v27 = vld [vmem:[#allocation11 + $0x28] sm:$0xff]  ;;  %v4214_v12 = vld [vmem:[#allocation11 + $0x20] sm:$0xff] }
 0x17e   :  { %2624 = vmatpush.bf16.msrb.mxu2 %v4215_v27 }
 0x17f   :  { %v1841_v14 = vadd.f32 %v1840_v13, %v1828_v16  ;;  %v4213_v16 = vld [vmem:[#allocation11 + $0x18] sm:$0xff] }
 0x182   :  { %2625 = vmatpush.bf16.msrb.mxu2 %v4214_v12 }
 0x184   :  { %v1853_v15 = vpop.f32.mrf.mxu2  ;;  %v1829_v23 = vpop.f32.mrf.mxu0 }
 0x185   :  { %v1854_v17 = vadd.f32 %v1853_v15, %v1841_v14  ;;  %v1866_v21 = vpop.f32.mrf.mxu3  ;;  %v1842_v28 = vpop.f32.mrf.mxu1  ;;  %v4212_v14 = vld [vmem:[#allocation11 + $0x10] sm:$0xff]  ;;  %v4211_v15 = vld [vmem:[#allocation11 + $0x8] sm:$0xff]  ;;  %v4210_v23 = vld [vmem:[#allocation11] sm:$0xff] }
 0x186   :  { %2626 = vmatpush.bf16.msrb.mxu2 %v4213_v16 }
 0x187   :  { %v1867_v24 = vadd.f32 %v1866_v21, %v1854_v17  ;;  %v4231_v21 = vld [vmem:[%s4602_s6] ss:$0 sm:$0xff] }
 0x189   :  { %v1873_v34 = vmax.f32 %v1867_v24, 0.0 }
 0x18a   :  { %2627 = vmatpush.bf16.msrb.mxu2 %v4212_v14 }
 0x18b   :  { %v1877_v25 = vpack.c.bf16 %v1873_v34, %v1873_v34 }
 0x18c   :  { %v1855_v8 = vpop.f32.mrf.mxu2 }
 0x18d   :  { %v1868_v29 = vpop.f32.mrf.mxu3  ;;  %2315 = vmatmul.bf16.vlgmr.msrb.gmra.mxu3 %v1877_v25 }
 0x18e   :  { %2628 = vmatpush.bf16.msrb.mxu2 %v4211_v15 }
 0x192   :  { %2629 = vmatpush.bf16.msrb.mxu2 %v4210_v23 }
 0x19c   :  { %v2277_v43 = vpop.f32.mrf.mxu0 }
 0x19d   :  { %2367 = vmatmul.bf16.vlgmr.msra.gmra.mxu3 %v1877_v25  ;;  %v2278_v32 = vadd.f32 %v2277_v43, %v1944_v31 }
 0x1a3   :  { %v2290_v33 = vpop.f32.mrf.mxu1 }
 0x1a4   :  { %v2279_v20 = vpop.f32.mrf.mxu0  ;;  %v2291_v10 = vadd.f32 %v2290_v33, %v2278_v32 }
 0x1ab   :  { %v2292_v35 = vpop.f32.mrf.mxu1 }
 0x1bc   :  { %v2329_v41 = vpop.f32.mrf.mxu0 }
 0x1bd   :  { %v2330_v36 = vadd.f32 %v2329_v41, %v1945_v40  ;;  %v2342_v38 = vpop.f32.mrf.mxu1 }
 0x1bf   :  { %v2343_v37 = vadd.f32 %v2342_v38, %v2330_v36 }
 0x1c4   :  { %v2331_v39 = vpop.f32.mrf.mxu0 }
 0x1c5   :  { %v2344_v42 = vpop.f32.mrf.mxu1 }
 0x1e6   :  { %v2303_v52 = vpop.f32.mrf.mxu2 }
 0x1e7   :  { %v2304_v18 = vadd.f32 %v2303_v52, %v2291_v10 }
 0x1ee   :  { %v2305_v48 = vpop.f32.mrf.mxu2 }
 0x1f6   :  { %v2355_v26 = vpop.f32.mrf.mxu2 }
 0x1f7   :  { %v2356_v3 = vadd.f32 %v2355_v26, %v2343_v37  ;;  %v4232_v37 = vld [vmem:[%s4604_s8] ss:$0 sm:$0xff] }
 0x1fe   :  { %v2357_v59 = vpop.f32.mrf.mxu2 }
 0x210   :  { %v2316_v19 = vpop.f32.mrf.mxu3 }
 0x211   :  { %v2317_v0 = vadd.f32 %v2316_v19, %v2304_v18 }
 0x213   :  { %v2372_v49 = vmax.f32 %v2317_v0, 0.0 }
 0x215   :  { %v2374_v1 = vpack.c.bf16 %v2372_v49, %v2372_v49 }
 0x217   :  { %2516 = vmatmul.bf16.vlgmr.msrb.gmra.mxu0 %v2374_v1 }
 0x218   :  { %v2318_v2 = vpop.f32.mrf.mxu3 }
 0x220   :  { %v2368_v4 = vpop.f32.mrf.mxu3 }
 0x221   :  { %v2369_v62 = vadd.f32 %v2368_v4, %v2356_v3 }
 0x223   :  { %v2373_v5 = vmax.f32 %v2369_v62, 0.0 }
 0x225   :  { %v2375_v6 = vpack.c.bf16 %v2373_v5, %v2373_v5 }
 0x227   :  { %2529 = vmatmul.bf16.vlgmr.msrb.gmra.mxu1 %v2375_v6 }
 0x228   :  { %v2370_v7 = vpop.f32.mrf.mxu3 }
 0x294   :  { %v2517_v13 = vpop.f32.mrf.mxu0 }
 0x295   :  { %v2518_v28 = vadd.f32 %v4231_v21, %v2517_v13 }
 0x29c   :  { %v2519_v17 = vpop.f32.mrf.mxu0 }
 0x2a4   :  { %v2530_v24 = vpop.f32.mrf.mxu1 }
 0x2a5   :  { %v2531_v34 = vadd.f32 %v2530_v24, %v2518_v28 }
 0x2a7   :  { %v3873_v25 = vmul.f32 -1.442695, %v2531_v34 }
 0x2a9   :  { %4233 = vpow2.f32 %v3873_v25 }
 0x2ac   :  { %v2532_v8 = vpop.f32.mrf.mxu1 }
 0x2af   :  { %v4234_v29 = vpop.eup %4233 }
 0x2b0   :  { %v2537_v43 = vadd.f32 1.0, %v4234_v29 }
 0x2b2   :  { %4235 = vrcp.f32 %v2537_v43  ;;  %v2549_v32 = vand.u32 2147483648, %v2537_v43  ;;  %v2547_v10 = vand.u32 2147483647, %v2537_v43  ;;  %vm2543_vm1 = vweird.f32 %v2537_v43 }
 0x2b4   :  { %v2550_v40 = vor.u32 1.1754944e-38, %v2549_v32  ;;  %vm2548_vm3 = vcmp.eq.f32.partialorder %v2547_v10, 8.507059e+37 }
 0x2b8   :  { %v4236_v30 = vpop.eup %4235 }
 0x2b9   :  { %v2539_v20 = vmul.f32 %v4236_v30, %v2537_v43  ;;  %vm2544_vm0 = vweird.f32 %v4236_v30 }
 0x2ba   :  { %vm2545_vm2 = vmor %vm2543_vm1, %vm2544_vm0 }
 0x2bb   :  { %v2540_v31 = vsub.f32 1.0, %v2539_v20 }
 0x2bd   :  { %v2541_v33 = vmul.f32 %v4236_v30, %v2540_v31 }
 0x2bf   :  { %v2542_v35 = vadd.f32 %v4236_v30, %v2541_v33 }
 0x2c1   :  { %v2546_v41 = vsel %vm2545_vm2, %v4236_v30, %v2542_v35 }
 0x2c2   :  { %v2551_v36 = vsel %vm2548_vm3, %v2550_v40, %v2546_v41 }
 0x2c3   :  { %v2553_v38 = vpack.c.bf16 %v2551_v36, %v2551_v36 }
 0x2c5   :  { %2630 = vmatmul.bf16.vlgmr.msrb.gmra.mxu2 %v2553_v38 }
 0x348   :  { %v2631_v39 = vpop.f32.mrf.mxu2 }
 0x349   :  { %v2632_v42 = vadd.f32 %v4232_v37, %v2631_v39 }
 0x34b   :  { %v2635_v58 = vpack.c.bf16 %v2632_v42, %v2632_v42 }
 0x34d   :  { %2636 = vst [vmem:[#allocation13] sm:$0xf] %v2635_v58 }
 0x34e   :  { %2647 = dma.vmem_to_hbm [thread:$0]  %s2643_s1, 64, %s2645_s25, [#allocation4]  }
 0x350   :  { %v2633_v44 = vpop.f32.mrf.mxu2 }
 0x351   :  { %4413 = dma.done.wait [#allocation4], 64  }
 0x352   :  { %4414 = vsyncadd [#allocation4], 4294967232 }
 0x353   :  { %2652 = vsyncpa [#allocation3], 1 }
 0x354   :  { %2653 = vsyncpa [#allocation6], 1 }
 0x355   :  { %2654 = vsyncpa [#allocation9], 1 }
 0x356   :  { %2655 = vsyncpa [#allocation12], 1 }
 0x357   :  { %2656 = vsyncpa [#allocation4], 1 }

</bundles_post_ra>
